<compile_context>
chip_gen: v7x
topology: tpu7x:2x2x1
jax: 0.10.0
libtpu: 0.0.40
codegen_flags: <defaults>
</compile_context>

<pallas_src>
import functools

import jax
import jax.numpy as jnp
from jax.experimental import pallas as pl
from jax.experimental.pallas import tpu as pltpu

_LANE = 128
_SUBLANE = 8


def _round_up(x: int, m: int) -> int:
    return ((x + m - 1) // m) * m


def _cdiv(a: int, b: int) -> int:
    return (a + b - 1) // b


def _fused_mlp_kernel(x_ref, *refs, num_layers: int, compute_dtype):
    """Fused MLP for one M-tile.

    x_ref        : (TM, Kp_0)      padded input activations for this tile
    refs[2*l]    : (Kp_l, Np_l)    zero-padded weight of layer l (VMEM-resident)
    refs[2*l+1]  : (1, Np_l)       zero-padded f32 bias of layer l
    refs[-1]     : (TM, Np_last)   padded output tile
    """
    o_ref = refs[-1]
    f32_compute = jnp.dtype(compute_dtype) == jnp.dtype(jnp.float32)

    h = x_ref[...]
    for l in range(num_layers):
        w = refs[2 * l][...]
        b = refs[2 * l + 1][...]
        dot_kwargs = dict(preferred_element_type=jnp.float32)
        if f32_compute:
            # Full-precision f32 MXU passes (matches the f32 reference).
            dot_kwargs["precision"] = jax.lax.Precision.HIGHEST
        acc = jnp.dot(h.astype(compute_dtype), w, **dot_kwargs)
        # Bias + ReLU epilogue in f32 on the VPU (free filler under MXU-bound).
        acc = acc + b.astype(jnp.float32)
        if l < num_layers - 1:
            acc = jnp.maximum(acc, 0.0)
        h = acc
    o_ref[...] = h.astype(o_ref.dtype)


class PallasMLP:
    """Fused Linear->ReLU->...->Linear MLP as a single Pallas TPU kernel.

    `params` is a list of (W (n_in, n_out), b (1, n_out)) per layer.  Weights
    and biases are zero-padded per layer to lane-aligned shapes once, here,
    so the per-call path never touches full weight bytes with pad/concat ops.
    """

    def __init__(self, params, compute_dtype=jnp.float32):
        self.num_layers = len(params)
        self.compute_dtype = jnp.dtype(compute_dtype)
        self.d_in = int(params[0][0].shape[0])
        self.d_out = int(params[-1][0].shape[1])

        self.layer_pads = []  # (Kp_l, Np_l) per layer
        self.w_pad = []
        self.b_pad = []
        for w, b in params:
            n_in, n_out = int(w.shape[0]), int(w.shape[1])
            kp, np_ = _round_up(n_in, _LANE), _round_up(n_out, _LANE)
            self.layer_pads.append((kp, np_))
            wp = (
                jnp.zeros((kp, np_), dtype=self.compute_dtype)
                .at[:n_in, :n_out]
                .set(w.astype(self.compute_dtype))
            )
            bp = (
                jnp.zeros((1, np_), dtype=jnp.float32)
                .at[:, :n_out]
                .set(b.reshape(1, -1).astype(jnp.float32))
            )
            self.w_pad.append(wp)
            self.b_pad.append(bp)

    def __call__(self, x, *, tile_m: int = 1024):
        orig_shape = x.shape
        assert orig_shape[-1] == self.d_in
        x2d = x.reshape(-1, self.d_in)
        M = x2d.shape[0]
        dtype = x.dtype
        itemsize = jnp.dtype(dtype).itemsize
        w_isz = self.compute_dtype.itemsize

        Kp0 = self.layer_pads[0][0]
        NpL = self.layer_pads[-1][1]
        max_np = max(np_ for _, np_ in self.layer_pads)

        # --- Generation-aware VMEM budget -------------------------------------
        try:
            vmem_cap = int(pltpu.get_tpu_info().vmem_capacity_bytes)
        except Exception:
            vmem_cap = 64 << 20  # conservative: v7x per-TensorCore VMEM
        vmem_cap = int(vmem_cap * 0.8)  # leave compiler headroom

        weight_bytes = sum(kp * np_ * w_isz + np_ * 4 for kp, np_ in self.layer_pads)

        def tile_bytes(tm):
            # double-buffered in/out tiles + f32 intermediate activations
            return (
                2 * tm * Kp0 * itemsize
                + 2 * tm * NpL * itemsize
                + 2 * tm * max_np * 4
            )

        # --- Token-axis tile ---------------------------------------------------
        tm = min(tile_m, _round_up(M, _SUBLANE))
        tm = _round_up(tm, _SUBLANE)
        # Shrink until double-buffered tiles + (conservatively 2x) weights fit.
        while tm > _SUBLANE and tile_bytes(tm) + 2 * weight_bytes > vmem_cap:
            tm = _round_up(max(tm // 2, _SUBLANE), _SUBLANE)
        # With enough rows, keep >=2 grid steps so the "parallel" axis can shard
        # across both TensorCores on v7x (harmless on v5e/v6e).
        if M > 256 and _cdiv(M, tm) < 2:
            tm = _round_up(_cdiv(M, 2), _SUBLANE)
        Mp = _round_up(M, tm)
        grid = (Mp // tm,)

        needed = tile_bytes(tm) + 2 * weight_bytes
        vmem_limit = int(min(max(int(needed * 1.5), 32 << 20), vmem_cap))

        # Pad activations: feature axis to Kp0 only, token axis to a multiple
        # of tm (zero rows/cols are exact: padded W rows/cols and biases are 0).
        x_pad = jnp.zeros((Mp, Kp0), dtype=dtype).at[:M, : self.d_in].set(x2d)

        kernel = functools.partial(
            _fused_mlp_kernel,
            num_layers=self.num_layers,
            compute_dtype=self.compute_dtype,
        )
        out_shape = jax.ShapeDtypeStruct((Mp, NpL), dtype)
        x_spec = pl.BlockSpec((tm, Kp0), lambda i: (i, 0))
        out_spec = pl.BlockSpec((tm, NpL), lambda i: (i, 0))

        def build(single_buffer_weights: bool):
            wb_specs = []
            for kp, np_ in self.layer_pads:
                if single_buffer_weights:
                    # Constant block index -> no need to double-buffer; halves
                    # resident weight VMEM.
                    wb_specs.append(
                        pl.BlockSpec(
                            (kp, np_), lambda i: (0, 0), pipeline_mode=pl.Buffered(1)
                        )
                    )
                    wb_specs.append(
                        pl.BlockSpec(
                            (1, np_), lambda i: (0, 0), pipeline_mode=pl.Buffered(1)
                        )
                    )
                else:
                    wb_specs.append(pl.BlockSpec((kp, np_), lambda i: (0, 0)))
                    wb_specs.append(pl.BlockSpec((1, np_), lambda i: (0, 0)))
            return pl.pallas_call(
                kernel,
                out_shape=out_shape,
                grid_spec=pltpu.PrefetchScalarGridSpec(
                    num_scalar_prefetch=0,
                    grid=grid,
                    in_specs=[x_spec] + wb_specs,
                    out_specs=out_spec,
                ),
                compiler_params=pltpu.CompilerParams(
                    dimension_semantics=("parallel",),
                    vmem_limit_bytes=vmem_limit,
                ),
            )

        args = [x_pad]
        for wp, bp in zip(self.w_pad, self.b_pad):
            args.extend((wp, bp))

        try:
            out_pad = build(True)(*args)
        except Exception:
            # pipeline_mode / Buffered(1) support varies across JAX versions;
            # fall back to default double-buffered weight specs.
            out_pad = build(False)(*args)

        out = out_pad[:M, : self.d_out]
        return out.reshape(*orig_shape[:-1], self.d_out)


def init_mlp_params(key, input_dim, hidden_dim, output_dim, num_layers, dtype=jnp.float32):
    """Deterministic synthetic init matching nn.Linear shapes.

    PyTorch stores weight as (out, in); we store the transpose (in, out) so the
    kernel computes x @ W_T + b directly.
    """
    h = [hidden_dim] * (num_layers - 1)
    in_dims = [input_dim] + h
    out_dims = h + [output_dim]
    params = []
    for n_in, n_out in zip(in_dims, out_dims):
        key, kw, kb = jax.random.split(key, 3)
        bound = 1.0 / float(n_in) ** 0.5
        w = jax.random.uniform(kw, (n_in, n_out), dtype=dtype, minval=-bound, maxval=bound)
        b = jax.random.uniform(kb, (1, n_out), dtype=dtype, minval=-bound, maxval=bound)
        params.append((w, b))
    return params


def mlp_reference(x, params):
    """Pure-JAX reference (full-precision f32 matmuls)."""
    orig_shape = x.shape
    h = x.reshape(-1, orig_shape[-1])
    n = len(params)
    for i, (w, b) in enumerate(params):
        h = jnp.dot(h, w, precision=jax.lax.Precision.HIGHEST) + b
        if i < n - 1:
            h = jnp.maximum(h, 0.0)
    return h.reshape(*orig_shape[:-1], h.shape[-1])


if __name__ == "__main__":
    key = jax.random.PRNGKey(0)

    # --- Small MLP matching the module spec: 16 -> 32 -> 32 -> 8, 3 layers ---
    input_dim, hidden_dim, output_dim, num_layers = 16, 32, 8, 3
    batch, seq = 2, 8
    key, kx, kp = jax.random.split(key, 3)
    x = jax.random.normal(kx, (batch, seq, input_dim), dtype=jnp.float32)
    params = init_mlp_params(kp, input_dim, hidden_dim, output_dim, num_layers)

    mlp = PallasMLP(params)  # pads / caches weights once (f32 compute)
    out = jax.block_until_ready(mlp(x))
    ref = mlp_reference(x, params)
    assert out.shape == (batch, seq, output_dim), out.shape
    assert jnp.allclose(out, ref, atol=1e-5, rtol=1e-5), "mismatch vs reference (small)"

    # --- Second config: mixed layer widths, ragged M, multi-step grid --------
    in2, hid2, out2, nl2 = 40, 256, 24, 2
    M2 = 520
    key, kx2, kp2 = jax.random.split(key, 3)
    x2 = jax.random.normal(kx2, (M2, in2), dtype=jnp.float32)
    params2 = init_mlp_params(kp2, in2, hid2, out2, nl2)
    mlp2 = PallasMLP(params2)
    out2_ = jax.block_until_ready(mlp2(x2, tile_m=256))
    ref2 = mlp_reference(x2, params2)
    assert out2_.shape == (M2, out2), out2_.shape
    assert jnp.allclose(out2_, ref2, atol=1e-4, rtol=1e-4), "mismatch vs reference (mixed)"

    print("KERNEL_OK")
</pallas_src>

<mosaic_0001>
module attributes {stable_mosaic.version = 11 : i64} {
  func.func @_fused_mlp_kernel(%arg0: i32, %arg1: memref<16x128xf32, #tpu.memory_space<vmem>>, %arg2: memref<128x128xf32, #tpu.memory_space<vmem>>, %arg3: memref<1x128xf32, #tpu.memory_space<vmem>>, %arg4: memref<128x128xf32, #tpu.memory_space<vmem>>, %arg5: memref<1x128xf32, #tpu.memory_space<vmem>>, %arg6: memref<128x128xf32, #tpu.memory_space<vmem>>, %arg7: memref<1x128xf32, #tpu.memory_space<vmem>>, %arg8: memref<16x128xf32, #tpu.memory_space<vmem>>) attributes {dimension_semantics = [#tpu.dimension_semantics<parallel>], iteration_bounds = array<i64: 1>, scalar_prefetch = 0 : i64, scratch_operands = 0 : i64, tpu.core_type = #tpu.core_type<tc>, window_params = [{transform_indices = @transform_0, window_bounds = array<i64: 16, 128>}, {pipeline_mode = #tpu.pipeline_mode<synchronous>, transform_indices = @transform_1, window_bounds = array<i64: 128, 128>}, {pipeline_mode = #tpu.pipeline_mode<synchronous>, transform_indices = @transform_2, window_bounds = array<i64: 1, 128>}, {pipeline_mode = #tpu.pipeline_mode<synchronous>, transform_indices = @transform_3, window_bounds = array<i64: 128, 128>}, {pipeline_mode = #tpu.pipeline_mode<synchronous>, transform_indices = @transform_4, window_bounds = array<i64: 1, 128>}, {pipeline_mode = #tpu.pipeline_mode<synchronous>, transform_indices = @transform_5, window_bounds = array<i64: 128, 128>}, {pipeline_mode = #tpu.pipeline_mode<synchronous>, transform_indices = @transform_6, window_bounds = array<i64: 1, 128>}, {transform_indices = @transform_7, window_bounds = array<i64: 16, 128>}]} {
    %c0 = arith.constant 0 : index
    %c0_0 = arith.constant 0 : index
    %0 = vector.load %arg1[%c0, %c0_0] : memref<16x128xf32, #tpu.memory_space<vmem>>, vector<16x128xf32>
    %c0_1 = arith.constant 0 : index
    %c0_2 = arith.constant 0 : index
    %1 = vector.load %arg2[%c0_1, %c0_2] : memref<128x128xf32, #tpu.memory_space<vmem>>, vector<128x128xf32>
    %c0_3 = arith.constant 0 : index
    %c0_4 = arith.constant 0 : index
    %2 = vector.load %arg3[%c0_3, %c0_4] : memref<1x128xf32, #tpu.memory_space<vmem>>, vector<1x128xf32>
    %cst = arith.constant dense<0.000000e+00> : vector<16x128xf32>
    %3 = tpu.matmul %0, %1, %cst {dimension_numbers = #tpu.dot_dimension_numbers<[1], [0], [0], [1], [0, 0, 1, 1], [], []>, precision = #tpu.contract_precision<fp32>} : vector<16x128xf32>, vector<128x128xf32>, vector<16x128xf32> -> vector<16x128xf32>
    %4 = vector.broadcast %2 : vector<1x128xf32> to vector<16x128xf32>
    %5 = arith.addf %3, %4 : vector<16x128xf32>
    %cst_5 = arith.constant 0.000000e+00 : f32
    %6 = vector.broadcast %cst_5 : f32 to vector<16x128xf32>
    %7 = arith.maximumf %5, %6 : vector<16x128xf32>
    %c0_6 = arith.constant 0 : index
    %c0_7 = arith.constant 0 : index
    %8 = vector.load %arg4[%c0_6, %c0_7] : memref<128x128xf32, #tpu.memory_space<vmem>>, vector<128x128xf32>
    %c0_8 = arith.constant 0 : index
    %c0_9 = arith.constant 0 : index
    %9 = vector.load %arg5[%c0_8, %c0_9] : memref<1x128xf32, #tpu.memory_space<vmem>>, vector<1x128xf32>
    %cst_10 = arith.constant dense<0.000000e+00> : vector<16x128xf32>
    %10 = tpu.matmul %7, %8, %cst_10 {dimension_numbers = #tpu.dot_dimension_numbers<[1], [0], [0], [1], [0, 0, 1, 1], [], []>, precision = #tpu.contract_precision<fp32>} : vector<16x128xf32>, vector<128x128xf32>, vector<16x128xf32> -> vector<16x128xf32>
    %11 = vector.broadcast %9 : vector<1x128xf32> to vector<16x128xf32>
    %12 = arith.addf %10, %11 : vector<16x128xf32>
    %cst_11 = arith.constant 0.000000e+00 : f32
    %13 = vector.broadcast %cst_11 : f32 to vector<16x128xf32>
    %14 = arith.maximumf %12, %13 : vector<16x128xf32>
    %c0_12 = arith.constant 0 : index
    %c0_13 = arith.constant 0 : index
    %15 = vector.load %arg6[%c0_12, %c0_13] : memref<128x128xf32, #tpu.memory_space<vmem>>, vector<128x128xf32>
    %c0_14 = arith.constant 0 : index
    %c0_15 = arith.constant 0 : index
    %16 = vector.load %arg7[%c0_14, %c0_15] : memref<1x128xf32, #tpu.memory_space<vmem>>, vector<1x128xf32>
    %cst_16 = arith.constant dense<0.000000e+00> : vector<16x128xf32>
    %17 = tpu.matmul %14, %15, %cst_16 {dimension_numbers = #tpu.dot_dimension_numbers<[1], [0], [0], [1], [0, 0, 1, 1], [], []>, precision = #tpu.contract_precision<fp32>} : vector<16x128xf32>, vector<128x128xf32>, vector<16x128xf32> -> vector<16x128xf32>
    %18 = vector.broadcast %16 : vector<1x128xf32> to vector<16x128xf32>
    %19 = arith.addf %17, %18 : vector<16x128xf32>
    %c0_17 = arith.constant 0 : index
    %c0_18 = arith.constant 0 : index
    %20 = vector.load %arg8[%c0_17, %c0_18] : memref<16x128xf32, #tpu.memory_space<vmem>>, vector<16x128xf32>
    tpu.vector_store %arg8[%c0_17, %c0_18], %19 {strides = array<i32>} : memref<16x128xf32, #tpu.memory_space<vmem>>, vector<16x128xf32>,
    return
  }
  func.func @transform_0(%arg0: i32) -> (i32, i32) {
    %c0_i32 = arith.constant 0 : i32
    %c0_i32_0 = arith.constant 0 : i32
    return %arg0, %c0_i32 : i32, i32
  }
  func.func @transform_1(%arg0: i32) -> (i32, i32) {
    %c0_i32 = arith.constant 0 : i32
    %c0_i32_0 = arith.constant 0 : i32
    %c0_i32_1 = arith.constant 0 : i32
    return %c0_i32, %c0_i32_0 : i32, i32
  }
  func.func @transform_2(%arg0: i32) -> (i32, i32) {
    %c0_i32 = arith.constant 0 : i32
    %c0_i32_0 = arith.constant 0 : i32
    %c0_i32_1 = arith.constant 0 : i32
    return %c0_i32, %c0_i32_0 : i32, i32
  }
  func.func @transform_3(%arg0: i32) -> (i32, i32) {
    %c0_i32 = arith.constant 0 : i32
    %c0_i32_0 = arith.constant 0 : i32
    %c0_i32_1 = arith.constant 0 : i32
    return %c0_i32, %c0_i32_0 : i32, i32
  }
  func.func @transform_4(%arg0: i32) -> (i32, i32) {
    %c0_i32 = arith.constant 0 : i32
    %c0_i32_0 = arith.constant 0 : i32
    %c0_i32_1 = arith.constant 0 : i32
    return %c0_i32, %c0_i32_0 : i32, i32
  }
  func.func @transform_5(%arg0: i32) -> (i32, i32) {
    %c0_i32 = arith.constant 0 : i32
    %c0_i32_0 = arith.constant 0 : i32
    %c0_i32_1 = arith.constant 0 : i32
    return %c0_i32, %c0_i32_0 : i32, i32
  }
  func.func @transform_6(%arg0: i32) -> (i32, i32) {
    %c0_i32 = arith.constant 0 : i32
    %c0_i32_0 = arith.constant 0 : i32
    %c0_i32_1 = arith.constant 0 : i32
    return %c0_i32, %c0_i32_0 : i32, i32
  }
  func.func @transform_7(%arg0: i32) -> (i32, i32) {
    %c0_i32 = arith.constant 0 : i32
    %c0_i32_0 = arith.constant 0 : i32
    return %arg0, %c0_i32 : i32, i32
  }
}

module attributes {stable_mosaic.version = 11 : i64} {
  func.func @_fused_mlp_kernel(%arg0: i32, %arg1: memref<16x128xf32, #tpu.memory_space<vmem>>, %arg2: memref<128x128xf32, #tpu.memory_space<vmem>>, %arg3: memref<1x128xf32, #tpu.memory_space<vmem>>, %arg4: memref<128x128xf32, #tpu.memory_space<vmem>>, %arg5: memref<1x128xf32, #tpu.memory_space<vmem>>, %arg6: memref<128x128xf32, #tpu.memory_space<vmem>>, %arg7: memref<1x128xf32, #tpu.memory_space<vmem>>, %arg8: memref<16x128xf32, #tpu.memory_space<vmem>>) attributes {dimension_semantics = [#tpu.dimension_semantics<parallel>], iteration_bounds = array<i64: 1>, scalar_prefetch = 0 : i64, scratch_operands = 0 : i64, tpu.core_type = #tpu.core_type<tc>, window_params = [{transform_indices = @transform_0, window_bounds = array<i64: 16, 128>}, {pipeline_mode = #tpu.pipeline_mode<synchronous>, transform_indices = @transform_1, window_bounds = array<i64: 128, 128>}, {pipeline_mode = #tpu.pipeline_mode<synchronous>, transform_indices = @transform_2, window_bounds = array<i64: 1, 128>}, {pipeline_mode = #tpu.pipeline_mode<synchronous>, transform_indices = @transform_3, window_bounds = array<i64: 128, 128>}, {pipeline_mode = #tpu.pipeline_mode<synchronous>, transform_indices = @transform_4, window_bounds = array<i64: 1, 128>}, {pipeline_mode = #tpu.pipeline_mode<synchronous>, transform_indices = @transform_5, window_bounds = array<i64: 128, 128>}, {pipeline_mode = #tpu.pipeline_mode<synchronous>, transform_indices = @transform_6, window_bounds = array<i64: 1, 128>}, {transform_indices = @transform_7, window_bounds = array<i64: 16, 128>}]} {
    %c0 = arith.constant 0 : index
    %c0_0 = arith.constant 0 : index
    %0 = vector.load %arg1[%c0, %c0_0] : memref<16x128xf32, #tpu.memory_space<vmem>>, vector<16x128xf32>
    %c0_1 = arith.constant 0 : index
    %c0_2 = arith.constant 0 : index
    %1 = vector.load %arg2[%c0_1, %c0_2] : memref<128x128xf32, #tpu.memory_space<vmem>>, vector<128x128xf32>
    %c0_3 = arith.constant 0 : index
    %c0_4 = arith.constant 0 : index
    %2 = vector.load %arg3[%c0_3, %c0_4] : memref<1x128xf32, #tpu.memory_space<vmem>>, vector<1x128xf32>
    %cst = arith.constant dense<0.000000e+00> : vector<16x128xf32>
    %3 = tpu.matmul %0, %1, %cst {dimension_numbers = #tpu.dot_dimension_numbers<[1], [0], [0], [1], [0, 0, 1, 1], [], []>, precision = #tpu.contract_precision<fp32>} : vector<16x128xf32>, vector<128x128xf32>, vector<16x128xf32> -> vector<16x128xf32>
    %4 = vector.broadcast %2 : vector<1x128xf32> to vector<16x128xf32>
    %5 = arith.addf %3, %4 : vector<16x128xf32>
    %cst_5 = arith.constant 0.000000e+00 : f32
    %6 = vector.broadcast %cst_5 : f32 to vector<16x128xf32>
    %7 = arith.maximumf %5, %6 : vector<16x128xf32>
    %c0_6 = arith.constant 0 : index
    %c0_7 = arith.constant 0 : index
    %8 = vector.load %arg4[%c0_6, %c0_7] : memref<128x128xf32, #tpu.memory_space<vmem>>, vector<128x128xf32>
    %c0_8 = arith.constant 0 : index
    %c0_9 = arith.constant 0 : index
    %9 = vector.load %arg5[%c0_8, %c0_9] : memref<1x128xf32, #tpu.memory_space<vmem>>, vector<1x128xf32>
    %cst_10 = arith.constant dense<0.000000e+00> : vector<16x128xf32>
    %10 = tpu.matmul %7, %8, %cst_10 {dimension_numbers = #tpu.dot_dimension_numbers<[1], [0], [0], [1], [0, 0, 1, 1], [], []>, precision = #tpu.contract_precision<fp32>} : vector<16x128xf32>, vector<128x128xf32>, vector<16x128xf32> -> vector<16x128xf32>
    %11 = vector.broadcast %9 : vector<1x128xf32> to vector<16x128xf32>
    %12 = arith.addf %10, %11 : vector<16x128xf32>
    %cst_11 = arith.constant 0.000000e+00 : f32
    %13 = vector.broadcast %cst_11 : f32 to vector<16x128xf32>
    %14 = arith.maximumf %12, %13 : vector<16x128xf32>
    %c0_12 = arith.constant 0 : index
    %c0_13 = arith.constant 0 : index
    %15 = vector.load %arg6[%c0_12, %c0_13] : memref<128x128xf32, #tpu.memory_space<vmem>>, vector<128x128xf32>
    %c0_14 = arith.constant 0 : index
    %c0_15 = arith.constant 0 : index
    %16 = vector.load %arg7[%c0_14, %c0_15] : memref<1x128xf32, #tpu.memory_space<vmem>>, vector<1x128xf32>
    %cst_16 = arith.constant dense<0.000000e+00> : vector<16x128xf32>
    %17 = tpu.matmul %14, %15, %cst_16 {dimension_numbers = #tpu.dot_dimension_numbers<[1], [0], [0], [1], [0, 0, 1, 1], [], []>, precision = #tpu.contract_precision<fp32>} : vector<16x128xf32>, vector<128x128xf32>, vector<16x128xf32> -> vector<16x128xf32>
    %18 = vector.broadcast %16 : vector<1x128xf32> to vector<16x128xf32>
    %19 = arith.addf %17, %18 : vector<16x128xf32>
    %c0_17 = arith.constant 0 : index
    %c0_18 = arith.constant 0 : index
    %20 = vector.load %arg8[%c0_17, %c0_18] : memref<16x128xf32, #tpu.memory_space<vmem>>, vector<16x128xf32>
    tpu.vector_store %arg8[%c0_17, %c0_18], %19 {strides = array<i32>} : memref<16x128xf32, #tpu.memory_space<vmem>>, vector<16x128xf32>,
    return
  }
  func.func @transform_0(%arg0: i32) -> (i32, i32) {
    %c0_i32 = arith.constant 0 : i32
    %c0_i32_0 = arith.constant 0 : i32
    return %arg0, %c0_i32 : i32, i32
  }
  func.func @transform_1(%arg0: i32) -> (i32, i32) {
    %c0_i32 = arith.constant 0 : i32
    %c0_i32_0 = arith.constant 0 : i32
    %c0_i32_1 = arith.constant 0 : i32
    return %c0_i32, %c0_i32_0 : i32, i32
  }
  func.func @transform_2(%arg0: i32) -> (i32, i32) {
    %c0_i32 = arith.constant 0 : i32
    %c0_i32_0 = arith.constant 0 : i32
    %c0_i32_1 = arith.constant 0 : i32
    return %c0_i32, %c0_i32_0 : i32, i32
  }
  func.func @transform_3(%arg0: i32) -> (i32, i32) {
    %c0_i32 = arith.constant 0 : i32
    %c0_i32_0 = arith.constant 0 : i32
    %c0_i32_1 = arith.constant 0 : i32
    return %c0_i32, %c0_i32_0 : i32, i32
  }
  func.func @transform_4(%arg0: i32) -> (i32, i32) {
    %c0_i32 = arith.constant 0 : i32
    %c0_i32_0 = arith.constant 0 : i32
    %c0_i32_1 = arith.constant 0 : i32
    return %c0_i32, %c0_i32_0 : i32, i32
  }
  func.func @transform_5(%arg0: i32) -> (i32, i32) {
    %c0_i32 = arith.constant 0 : i32
    %c0_i32_0 = arith.constant 0 : i32
    %c0_i32_1 = arith.constant 0 : i32
    return %c0_i32, %c0_i32_0 : i32, i32
  }
  func.func @transform_6(%arg0: i32) -> (i32, i32) {
    %c0_i32 = arith.constant 0 : i32
    %c0_i32_0 = arith.constant 0 : i32
    %c0_i32_1 = arith.constant 0 : i32
    return %c0_i32, %c0_i32_0 : i32, i32
  }
  func.func @transform_7(%arg0: i32) -> (i32, i32) {
    %c0_i32 = arith.constant 0 : i32
    %c0_i32_0 = arith.constant 0 : i32
    return %arg0, %c0_i32 : i32, i32
  }
}

</mosaic_0001>

<bundles_post_ra>
// kernel: tpu_custom_call.1
= control target key start
LH: loop header
LB: loop body
LE: loop exit
PB: predicated region body
PF: predicated region fallthrough
CT: control target
= control target key end

     0   :  { %12 = vsyncpa [#allocation3], 0  ;;  %s4999_s0 = inlined_call_operand.hbm [shape: f32[16,128], index: 0, kind: input, shape index: {}]   ;;  %s5000_s1 = inlined_call_operand.hbm [shape: f32[128,128], index: 1, kind: input, shape index: {}]   ;;  %s5001_s2 = inlined_call_operand.vmem [shape: f32[1,128], index: 2, kind: input, shape index: {}]   ;;  %s5002_s3 = inlined_call_operand.hbm [shape: f32[128,128], index: 3, kind: input, shape index: {}]   ;;  %s5003_s4 = inlined_call_operand.vmem [shape: f32[1,128], index: 4, kind: input, shape index: {}]   ;;  %s5004_s5 = inlined_call_operand.hbm [shape: f32[128,128], index: 5, kind: input, shape index: {}]   ;;  %s5005_s6 = inlined_call_operand.vmem [shape: f32[1,128], index: 6, kind: input, shape index: {}]   ;;  %s5006_s7 = inlined_call_operand.hbm [shape: f32[16,128], index: 7, kind: output, shape index: {}]  }
   0x1   :  { %13 = vsyncpa [#allocation6], 0 }
   0x2   :  { %14 = vsyncpa [#allocation9], 0 }
   0x3   :  { %15 = vsyncpa [#allocation4], 0  ;;  %s3924_s24 = smov [#allocation5]   ;;  %s3925_s26 = smov [#allocation2]  }
   0x4   :  { %s33_s25 = sshll.u32 %s3924_s24, 4  ;;  %s21_s27 = sshll.u32 %s3925_s26, 4  ;;  %s34_s25 = int_to_ptr.vmem [resolvable:$true] %s33_s25  ;;  %s3971_s27 = int_to_ptr.vmem [resolvable:$true] %s21_s27 }
   0x5   :  { %s3806_s30 = scalar_lea.hbm %s5000_s1, 2048 }
   0x6   :  { %p3807_p0 = scmp.ne.s32.totalorder %s5000_s1, %s3806_s30  ;;  %p3810_p1 = scmp.lt.u32.totalorder %s3806_s30, %s5000_s1 }
   0x8   :  { %p3812_p2 = pnand %p3810_p1, %p3807_p0 }
   0xa   :  { %3815 = shalt.err (!%p3812_p2)
}
   0xb   :  { %s3816_s12 = scalar_lea.vmem %s34_s25, 2048  ;;  %p3821_p4 = scmp.lt.s32.totalorder %s34_s25, %s34_s25 }
   0xc   :  { %p3817_p3 = scmp.ne.s32.totalorder %s34_s25, %s3816_s12  ;;  %p3822_p5 = scmp.lt.s32.totalorder %s3816_s12, %s3816_s12 }
   0xe   :  { %p3823_p6 = por %p3822_p5, %p3821_p4 }
  0x10   :  { %p3824_p7 = pnand %p3823_p6, %p3817_p3 }
  0x12   :  { %3827 = shalt.err (!%p3824_p7)
}
  0x13   :  { %s3926_s13 = smov 128   ;;  %s3927_s14 = smov 8  }
  0x14   :  { %39 = dma.hbm_to_vmem [thread:$0]  %s5000_s1, 2048, %s34_s25, [#allocation6], %s3926_s13, %s3926_s13, %s3927_s14  }
  0x15   :  { %s3828_s19 = scalar_lea.hbm %s4999_s0, 256 }
  0x16   :  { %p3829_p8 = scmp.ne.s32.totalorder %s4999_s0, %s3828_s19  ;;  %p3832_p9 = scmp.lt.u32.totalorder %s3828_s19, %s4999_s0 }
  0x18   :  { %p3834_p10 = pnand %p3832_p9, %p3829_p8 }
  0x1a   :  { %3837 = shalt.err (!%p3834_p10)
}
  0x1b   :  { %s3838_s24 = scalar_lea.vmem %s3971_s27, 256  ;;  %p3843_p12 = scmp.lt.s32.totalorder %s3971_s27, %s3971_s27 }
  0x1c   :  { %p3839_p11 = scmp.ne.s32.totalorder %s3971_s27, %s3838_s24  ;;  %p3844_p13 = scmp.lt.s32.totalorder %s3838_s24, %s3838_s24 }
  0x1e   :  { %p3845_p0 = por %p3844_p13, %p3843_p12 }
  0x20   :  { %p3846_p1 = pnand %p3845_p0, %p3839_p11 }
  0x22   :  { %3849 = shalt.err (!%p3846_p1)
}
  0x23   :  { %27 = dma.hbm_to_vmem [thread:$0]  %s4999_s0, 256, %s3971_s27, [#allocation3], %s3926_s13, %s3926_s13, %s3927_s14  }
  0x24   :  { %s3928_s26 = smov [#allocation7]   ;;  %s3929_s29 = smov [#allocation8]  }
  0x25   :  { %s47_s28 = sshll.u32 %s3928_s26, 4  ;;  %s61_s30 = sshll.u32 %s3929_s29, 4  ;;  %s48_s28 = int_to_ptr.vmem [resolvable:$true] %s47_s28  ;;  %s4008_s30 = int_to_ptr.vmem [resolvable:$true] %s61_s30 }
  0x26   :  { %s3850_s10 = scalar_lea.hbm %s5002_s3, 2048 }
  0x27   :  { %p3851_p2 = scmp.ne.s32.totalorder %s5002_s3, %s3850_s10  ;;  %p3854_p3 = scmp.lt.u32.totalorder %s3850_s10, %s5002_s3 }
  0x29   :  { %p3856_p4 = pnand %p3854_p3, %p3851_p2 }
  0x2b   :  { %3859 = shalt.err (!%p3856_p4)
}
  0x2c   :  { %s3860_s0 = scalar_lea.vmem %s48_s28, 2048  ;;  %p3865_p6 = scmp.lt.s32.totalorder %s48_s28, %s48_s28 }
  0x2d   :  { %p3861_p5 = scmp.ne.s32.totalorder %s48_s28, %s3860_s0  ;;  %p3866_p7 = scmp.lt.s32.totalorder %s3860_s0, %s3860_s0 }
  0x2f   :  { %p3867_p8 = por %p3866_p7, %p3865_p6 }
  0x31   :  { %p3868_p9 = pnand %p3867_p8, %p3861_p5 }
  0x33   :  { %3871 = shalt.err (!%p3868_p9)
}
  0x34   :  { %53 = dma.hbm_to_vmem [thread:$0]  %s5002_s3, 2048, %s48_s28, [#allocation6], %s3926_s13, %s3926_s13, %s3927_s14  }
  0x35   :  { %s3872_s20 = scalar_lea.hbm %s5004_s5, 2048 }
  0x36   :  { %p3873_p10 = scmp.ne.s32.totalorder %s5004_s5, %s3872_s20  ;;  %p3876_p11 = scmp.lt.u32.totalorder %s3872_s20, %s5004_s5 }
  0x38   :  { %p3878_p12 = pnand %p3876_p11, %p3873_p10 }
  0x3a   :  { %3881 = shalt.err (!%p3878_p12)
}
  0x3b   :  { %s3882_s1 = scalar_lea.vmem %s4008_s30, 2048  ;;  %p3887_p0 = scmp.lt.s32.totalorder %s4008_s30, %s4008_s30 }
  0x3c   :  { %p3883_p13 = scmp.ne.s32.totalorder %s4008_s30, %s3882_s1  ;;  %p3888_p1 = scmp.lt.s32.totalorder %s3882_s1, %s3882_s1 }
  0x3e   :  { %p3889_p2 = por %p3888_p1, %p3887_p0 }
  0x40   :  { %p3890_p3 = pnand %p3889_p2, %p3883_p13 }
  0x42   :  { %3893 = shalt.err (!%p3890_p3)
}
  0x43   :  { %67 = dma.hbm_to_vmem [thread:$0]  %s5004_s5, 2048, %s4008_s30, [#allocation9], %s3926_s13, %s3926_s13, %s3927_s14  }
  0x44   :  { %3916 = dma.done.wait [#allocation3], 256  }
  0x45   :  { %3917 = vsyncadd [#allocation3], 4294967040 }
  0x46   :  { %3918 = dma.done.wait [#allocation6], 4096  }
  0x47   :  { %3919 = vsyncadd [#allocation6], 4294963200 }
  0x48   :  { %3920 = dma.done.wait [#allocation9], 2048  }
  0x49   :  { %3921 = vsyncadd [#allocation9], 4294965248  ;;  %v84_v0 = vld [vmem:[#allocation5] sm:$0xff]  ;;  %v85_v1 = vld [vmem:[#allocation5 + $0x8] sm:$0xff]  ;;  %s3930_s30 = smov [#allocation10]  }
  0x4a   :  { %v86_v2 = vld [vmem:[#allocation5 + $0x10] sm:$0xff]  ;;  %v108_v3 = vand.u32 4294901760, %v84_v0  ;;  %v111_v4 = vand.u32 4294901760, %v85_v1  ;;  %v4045_v5 = vld [vmem:[#allocation5 + $0x18] sm:$0xff]  ;;  %v4047_v7 = vld [vmem:[#allocation5 + $0x20] sm:$0xff]  ;;  %s2216_s8 = sshll.u32 %s3930_s30, 4  ;;  %s2217_s8 = int_to_ptr.vmem [resolvable:$true] %s2216_s8 }
  0x4b   :  { %v114_v6 = vand.u32 4294901760, %v86_v2  ;;  %v4049_v8 = vld [vmem:[#allocation5 + $0x28] sm:$0xff]  ;;  %v117_v9 = vand.u32 4294901760, %v4045_v5  ;;  %v120_v11 = vand.u32 4294901760, %v4047_v7  ;;  %v4058_v14 = vld [vmem:[#allocation5 + $0x30] sm:$0xff]  ;;  %v4060_v15 = vld [vmem:[#allocation5 + $0x38] sm:$0xff]  ;;  %p3899_p5 = scmp.lt.s32.totalorder %s2217_s8, %s2217_s8 }
  0x4c   :  { %v4052_v10 = vpack.c.bf16 %v111_v4, %v108_v3  ;;  %v123_v12 = vand.u32 4294901760, %v4049_v8  ;;  %v82_v16 = vld [vmem:[#allocation2] sm:$0xff]  ;;  %v126_v19 = vand.u32 4294901760, %v4058_v14  ;;  %v129_v20 = vand.u32 4294901760, %v4060_v15  ;;  %v4078_v21 = vld [vmem:[#allocation5 + $0x40] sm:$0xff]  ;;  %v4080_v22 = vld [vmem:[#allocation5 + $0x48] sm:$0xff] }
  0x4d   :  { %v4056_v13 = vpack.c.bf16 %v117_v9, %v114_v6  ;;  %v4066_v17 = vand.u32 4294901760, %v82_v16  ;;  %v132_v26 = vand.u32 4294901760, %v4078_v21  ;;  %v135_v27 = vand.u32 4294901760, %v4080_v22  ;;  %v4098_v28 = vld [vmem:[#allocation5 + $0x50] sm:$0xff]  ;;  %v4100_v29 = vld [vmem:[#allocation5 + $0x58] sm:$0xff]  ;;  %v4115_v36 = vld [vmem:[#allocation5 + $0x60] sm:$0xff] }
  0x4e   :  { %3188 = vmatprep.subr.bf16.mxu1 %v4052_v10  ;;  %3284 = vmatprep.subr.bf16.mxu0 %v4052_v10  ;;  %v4074_v18 = vpack.c.bf16 %v123_v12, %v120_v11  ;;  %v4094_v25 = vpack.c.bf16 %v129_v20, %v126_v19  ;;  %v138_v31 = vand.u32 4294901760, %v4098_v28  ;;  %v83_v33 = vld [vmem:[#allocation2 + $0x8] sm:$0xff]  ;;  %v141_v35 = vand.u32 4294901760, %v4100_v29  ;;  %v4117_v37 = vld [vmem:[#allocation5 + $0x68] sm:$0xff]  ;;  %v4129_v43 = vld [vmem:[#allocation5 + $0x70] sm:$0xff]  ;;  %s3894_s9 = scalar_lea.vmem %s2217_s8, 256 }
  0x4f   :  { %3190 = vmatpush3.bf16.msra.mxu1 %v4052_v10  ;;  %3286 = vmatpush3.bf16.msra.mxu0 %v4052_v10  ;;  %v4083_v23 = vsub.f32 %v82_v16, %v4066_v17  ;;  %v4112_v34 = vpack.c.bf16 %v135_v27, %v132_v26  ;;  %v4119_v38 = vsub.f32 %v84_v0, %v108_v3  ;;  %v4123_v40 = vand.u32 4294901760, %v83_v33  ;;  %v4131_v44 = vld [vmem:[#allocation5 + $0x78] sm:$0xff]  ;;  %p3895_p4 = scmp.ne.s32.totalorder %s2217_s8, %s3894_s9  ;;  %p3900_p6 = scmp.lt.s32.totalorder %s3894_s9, %s3894_s9 }
  0x50   :  { %3192 = vmatprep.subr.bf16.mxu1 %v4056_v13  ;;  %3288 = vmatprep.subr.bf16.mxu0 %v4056_v13  ;;  %v4121_v39 = vsub.f32 %v85_v1, %v111_v4  ;;  %v144_v41 = vand.u32 4294901760, %v4115_v36  ;;  %v147_v42 = vand.u32 4294901760, %v4117_v37  ;;  %v4133_v45 = vsub.f32 %v86_v2, %v114_v6 }
  0x51   :  { %v190_v24 = vand.u32 4294901760, %v4083_v23  ;;  %v4141_v46 = vpack.c.bf16 %v141_v35, %v138_v31  ;;  %v211_v47 = vand.u32 4294901760, %v4119_v38  ;;  %v4146_v49 = vsub.f32 %v4045_v5, %v117_v9  ;;  %p3901_p7 = por %p3900_p6, %p3899_p5 }
  0x52   :  { %v218_v48 = vand.u32 4294901760, %v4121_v39  ;;  %v150_v50 = vand.u32 4294901760, %v4129_v43  ;;  %v153_v51 = vand.u32 4294901760, %v4131_v44  ;;  %v4151_v52 = vsub.f32 %v83_v33, %v4123_v40 }
  0x53   :  { %3194 = vmatpush3.bf16.msra.mxu1 %v4056_v13  ;;  %3290 = vmatpush3.bf16.msra.mxu0 %v4056_v13  ;;  %v191_v30 = vsub.f32 %v4083_v23, %v190_v24  ;;  %v4159_v53 = vpack.c.bf16 %v147_v42, %v144_v41  ;;  %v225_v54 = vand.u32 4294901760, %v4133_v45  ;;  %v4165_v55 = vsub.f32 %v4047_v7, %v120_v11  ;;  %p3902_p8 = pnand %p3901_p7, %p3895_p4 }
  0x54   :  { %3196 = vmatprep.subr.bf16.mxu1 %v4074_v18  ;;  %3292 = vmatprep.subr.bf16.mxu0 %v4074_v18  ;;  %v212_v56 = vsub.f32 %v4119_v38, %v211_v47  ;;  %v219_v57 = vsub.f32 %v4121_v39, %v218_v48  ;;  %v232_v58 = vand.u32 4294901760, %v4146_v49  ;;  %v4175_v59 = vsub.f32 %v4049_v8, %v123_v12 }
  0x55   :  { %2694 = vmatprep.mubr.f32.mxu0 %v190_v24  ;;  %v192_v32 = vand.u32 4294901760, %v191_v30  ;;  %v4181_v60 = vpack.c.bf16 %v153_v51, %v150_v50  ;;  %v200_v61 = vand.u32 4294901760, %v4151_v52  ;;  %v226_v62 = vsub.f32 %v4133_v45, %v225_v54 }
  0x56   :  { %v239_v63 = vand.u32 4294901760, %v4165_v55  ;;  %v4191_v0 = vsub.f32 %v4058_v14, %v126_v19  ;;  %v4196_v1 = vsub.f32 %v4060_v15, %v129_v20  ;;  %v213_v2 = vand.u32 4294901760, %v212_v56 }
  0x57   :  { %3198 = vmatpush3.bf16.msra.mxu1 %v4074_v18  ;;  %3294 = vmatpush3.bf16.msra.mxu0 %v4074_v18  ;;  %v220_v3 = vand.u32 4294901760, %v219_v57  ;;  %v233_v4 = vsub.f32 %v4146_v49, %v232_v58  ;;  %v246_v5 = vand.u32 4294901760, %v4175_v59  ;;  %v3315_v6 = vpack.c.bf16 %v218_v48, %v211_v47 }
  0x58   :  { %3200 = vmatprep.subr.bf16.mxu1 %v4094_v25  ;;  %3296 = vmatprep.subr.bf16.mxu0 %v4094_v25  ;;  %v201_v7 = vsub.f32 %v4151_v52, %v200_v61  ;;  %v4206_v8 = vsub.f32 %v4078_v21, %v132_v26  ;;  %v227_v9 = vand.u32 4294901760, %v226_v62  ;;  %v240_v11 = vsub.f32 %v4165_v55, %v239_v63 }
  0x59   :  { %2589 = vmatprep.mubr.f32.mxu1 %v192_v32  ;;  %v253_v12 = vand.u32 4294901760, %v4191_v0  ;;  %v260_v14 = vand.u32 4294901760, %v4196_v1  ;;  %v3219_v15 = vpack.c.bf16 %v220_v3, %v213_v2  ;;  %v234_v16 = vand.u32 4294901760, %v233_v4 }
  0x5a   :  { %v247_v19 = vsub.f32 %v4175_v59, %v246_v5  ;;  %v4219_v20 = vsub.f32 %v4080_v22, %v135_v27  ;;  %v202_v21 = vand.u32 4294901760, %v201_v7  ;;  %v3319_v24 = vpack.c.bf16 %v232_v58, %v225_v54 }
  0x5b   :  { %3202 = vmatpush3.bf16.msra.mxu1 %v4094_v25  ;;  %3298 = vmatpush3.bf16.msra.mxu0 %v4094_v25  ;;  %v267_v26 = vand.u32 4294901760, %v4206_v8  ;;  %v4225_v30 = vsub.f32 %v4098_v28, %v138_v31  ;;  %v254_v32 = vsub.f32 %v4191_v0, %v253_v12  ;;  %v261_v33 = vsub.f32 %v4196_v1, %v260_v14 }
  0x5c   :  { %3204 = vmatprep.subr.bf16.mxu1 %v4112_v34  ;;  %3300 = vmatprep.subr.bf16.mxu0 %v4112_v34  ;;  %v4234_v22 = vsub.f32 %v4100_v29, %v141_v35  ;;  %v3223_v27 = vpack.c.bf16 %v234_v16, %v227_v9  ;;  %v241_v47 = vand.u32 4294901760, %v240_v11  ;;  %v248_v48 = vand.u32 4294901760, %v247_v19 }
  0x5d   :  { %v274_v28 = vand.u32 4294901760, %v4219_v20  ;;  %v3323_v31 = vpack.c.bf16 %v246_v5, %v239_v63  ;;  %v268_v54 = vsub.f32 %v4206_v8, %v267_v26  ;;  %v4241_v56 = vsub.f32 %v4115_v36, %v144_v41 }
  0x5e   :  { %v255_v29 = vand.u32 4294901760, %v254_v32  ;;  %v262_v35 = vand.u32 4294901760, %v261_v33  ;;  %v281_v57 = vand.u32 4294901760, %v4225_v30  ;;  %v288_v58 = vand.u32 4294901760, %v4234_v22 }
  0x5f   :  { %3206 = vmatpush3.bf16.msra.mxu1 %v4112_v34  ;;  %3302 = vmatpush3.bf16.msra.mxu0 %v4112_v34  ;;  %v3227_v62 = vpack.c.bf16 %v248_v48, %v241_v47  ;;  %v4249_v63 = vsub.f32 %v4117_v37, %v147_v42  ;;  %v3327_v36 = vpack.c.bf16 %v260_v14, %v253_v12  ;;  %v269_v41 = vand.u32 4294901760, %v268_v54 }
  0x60   :  { %3208 = vmatprep.subr.bf16.mxu1 %v4141_v46  ;;  %3304 = vmatprep.subr.bf16.mxu0 %v4141_v46  ;;  %v3231_v2 = vpack.c.bf16 %v262_v35, %v255_v29  ;;  %v282_v3 = vsub.f32 %v4225_v30, %v281_v57  ;;  %v289_v4 = vsub.f32 %v4234_v22, %v288_v58  ;;  %v295_v5 = vand.u32 4294901760, %v4241_v56 }
  0x61   :  { %v302_v37 = vand.u32 4294901760, %v4249_v63  ;;  %v4260_v42 = vsub.f32 %v4129_v43, %v150_v50  ;;  %v4265_v7 = vsub.f32 %v4131_v44, %v153_v51  ;;  %v3331_v9 = vpack.c.bf16 %v274_v28, %v267_v26 }
  0x62   :  { %v283_v11 = vand.u32 4294901760, %v282_v3  ;;  %v290_v12 = vand.u32 4294901760, %v289_v4  ;;  %v296_v14 = vsub.f32 %v4241_v56, %v295_v5  ;;  %v3335_v51 = vpack.c.bf16 %v288_v58, %v281_v57  ;;  %v802_v57 = vld [vmem:[#allocation7 + $0x48] sm:$0xff]  ;;  %v805_v4 = vld [vmem:[#allocation7 + $0x60] sm:$0xff] }
  0x63   :  { %3210 = vmatpush3.bf16.msra.mxu1 %v4141_v46  ;;  %3306 = vmatpush3.bf16.msra.mxu0 %v4141_v46  ;;  %v303_v16 = vsub.f32 %v4249_v63, %v302_v37  ;;  %v309_v43 = vand.u32 4294901760, %v4260_v42  ;;  %v316_v50 = vand.u32 4294901760, %v4265_v7  ;;  %v3339_v33 = vpack.c.bf16 %v302_v37, %v295_v5  ;;  %v806_v5 = vld [vmem:[#allocation7 + $0x68] sm:$0xff] }
  0x64   :  { %3212 = vmatprep.subr.bf16.mxu1 %v4159_v53  ;;  %3308 = vmatprep.subr.bf16.mxu0 %v4159_v53  ;;  %v3239_v44 = vpack.c.bf16 %v290_v12, %v283_v11  ;;  %v297_v19 = vand.u32 4294901760, %v296_v14  ;;  %v3255_v54 = vpack.c.bf16 %v4146_v49, %v4133_v45  ;;  %v856_v37 = vand.u32 4294901760, %v806_v5  ;;  %v807_v11 = vld [vmem:[#allocation7 + $0x70] sm:$0xff]  ;;  %v808_v12 = vld [vmem:[#allocation7 + $0x78] sm:$0xff] }
  0x65   :  { %v317_v26 = vsub.f32 %v4265_v7, %v316_v50  ;;  %v859_v14 = vand.u32 4294901760, %v807_v11 }
  0x67   :  { %3214 = vmatpush3.bf16.msra.mxu1 %v4159_v53  ;;  %3310 = vmatpush3.bf16.msra.mxu0 %v4159_v53  ;;  %v318_v47 = vand.u32 4294901760, %v317_v26 }
  0x68   :  { %3216 = vmatprep.subr.bf16.mxu1 %v4181_v60  ;;  %3312 = vmatprep.subr.bf16.mxu0 %v4181_v60 }
  0x6b   :  { %3218 = vmatpush3.bf16.msra.mxu1 %v4181_v60  ;;  %3314 = vmatpush3.bf16.msra.mxu0 %v4181_v60 }
  0x6c   :  { %3220 = vmatprep.subr.bf16.mxu1 %v3219_v15  ;;  %3316 = vmatprep.subr.bf16.mxu0 %v3315_v6 }
  0x6e   :  { %2590 = vmatmul.mubr.f32.vlgmr.msra.gmra.mrb[0].mxu1 %v202_v21  ;;  %2695 = vmatmul.mubr.f32.vlgmr.msra.gmra.mrb[0].mxu0 %v200_v61  ;;  %v275_v61 = vsub.f32 %v4219_v20, %v274_v28  ;;  %v304_v21 = vand.u32 4294901760, %v303_v16  ;;  %v3343_v28 = vpack.c.bf16 %v316_v50, %v309_v43 }
  0x6f   :  { %3222 = vmatpush3.bf16.msra.mxu1 %v3219_v15  ;;  %3318 = vmatpush3.bf16.msra.mxu0 %v3315_v6 }
  0x70   :  { %3224 = vmatprep.subr.bf16.mxu1 %v3223_v27  ;;  %3320 = vmatprep.subr.bf16.mxu0 %v3319_v24  ;;  %v276_v6 = vand.u32 4294901760, %v275_v61  ;;  %v3243_v32 = vpack.c.bf16 %v304_v21, %v297_v19 }
  0x71   :  { %2624 = vmatprep.mubr.f32.mxu1 %v4066_v17  ;;  %2729 = vmatprep.mubr.f32.mxu0 %v4066_v17 }
  0x72   :  { %v3235_v15 = vpack.c.bf16 %v276_v6, %v269_v41  ;;  %v853_v6 = vand.u32 4294901760, %v805_v4 }
  0x73   :  { %3226 = vmatpush3.bf16.msra.mxu1 %v3223_v27  ;;  %3322 = vmatpush3.bf16.msra.mxu0 %v3319_v24  ;;  %v310_v24 = vsub.f32 %v4260_v42, %v309_v43 }
  0x74   :  { %3228 = vmatprep.subr.bf16.mxu1 %v3227_v62  ;;  %3324 = vmatprep.subr.bf16.mxu0 %v3323_v31 }
  0x75   :  { %v311_v27 = vand.u32 4294901760, %v310_v24 }
  0x77   :  { %3230 = vmatpush3.bf16.msra.mxu1 %v3227_v62  ;;  %3326 = vmatpush3.bf16.msra.mxu0 %v3323_v31  ;;  %v3247_v48 = vpack.c.bf16 %v318_v47, %v311_v27  ;;  %v3251_v31 = vpack.c.bf16 %v4121_v39, %v4119_v38  ;;  %v3259_v38 = vpack.c.bf16 %v4175_v59, %v4165_v55  ;;  %v4308_v55 = vld [vmem:[#allocation7 + $0x18] sm:$0xff]  ;;  %v844_v62 = vand.u32 4294901760, %v802_v57 }
  0x78   :  { %3232 = vmatprep.subr.bf16.mxu1 %v3231_v2  ;;  %3328 = vmatprep.subr.bf16.mxu0 %v3327_v36  ;;  %v3263_v39 = vpack.c.bf16 %v4196_v1, %v4191_v0  ;;  %v826_v0 = vand.u32 4294901760, %v4308_v55  ;;  %v4316_v1 = vld [vmem:[#allocation7 + $0x20] sm:$0xff] }
  0x7b   :  { %3234 = vmatpush3.bf16.msra.mxu1 %v3231_v2  ;;  %3330 = vmatpush3.bf16.msra.mxu0 %v3327_v36  ;;  %v804_v36 = vld [vmem:[#allocation7 + $0x58] sm:$0xff] }
  0x7c   :  { %3236 = vmatprep.subr.bf16.mxu1 %v3235_v15  ;;  %3332 = vmatprep.subr.bf16.mxu0 %v3331_v9  ;;  %v850_v2 = vand.u32 4294901760, %v804_v36 }
  0x7f   :  { %3238 = vmatpush3.bf16.msra.mxu1 %v3235_v15  ;;  %3334 = vmatpush3.bf16.msra.mxu0 %v3331_v9  ;;  %v862_v15 = vand.u32 4294901760, %v808_v12 }
  0x80   :  { %3240 = vmatprep.subr.bf16.mxu1 %v3239_v44  ;;  %3336 = vmatprep.subr.bf16.mxu0 %v3335_v51 }
  0x81   :  { %v4375_v50 = vpack.c.bf16 %v862_v15, %v859_v14 }
  0x83   :  { %3242 = vmatpush3.bf16.msra.mxu1 %v3239_v44  ;;  %3338 = vmatpush3.bf16.msra.mxu0 %v3335_v51 }
  0x84   :  { %3244 = vmatprep.subr.bf16.mxu1 %v3243_v32  ;;  %3340 = vmatprep.subr.bf16.mxu0 %v3339_v33 }
  0x87   :  { %3246 = vmatpush3.bf16.msra.mxu1 %v3243_v32  ;;  %3342 = vmatpush3.bf16.msra.mxu0 %v3339_v33  ;;  %v4390_v32 = vsub.f32 %v802_v57, %v844_v62 }
  0x88   :  { %3248 = vmatprep.subr.bf16.mxu1 %v3247_v48  ;;  %3344 = vmatprep.subr.bf16.mxu0 %v3343_v28 }
  0x89   :  { %v983_v27 = vand.u32 4294901760, %v4390_v32 }
  0x8b   :  { %3250 = vmatpush3.bf16.msra.mxu1 %v3247_v48  ;;  %3346 = vmatpush3.bf16.msra.mxu0 %v3343_v28  ;;  %v984_v48 = vsub.f32 %v4390_v32, %v983_v27 }
  0x8c   :  { %3252 = vmatprep.subr.bf16.mxu1 %v3251_v31  ;;  %3348 = vmatprep.subr.bf16.mxu0 %v4052_v10 }
  0x8e   :  { %2625 = vmatmul.mubr.f32.vlgmr.msra.gmra.mrb[0].mxu1 %v4123_v40  ;;  %2730 = vmatmul.mubr.f32.vlgmr.msra.gmra.mrb[0].mxu0 %v4123_v40 }
  0x8f   :  { %3254 = vmatpush3.bf16.msra.mxu1 %v3251_v31  ;;  %3350 = vmatpush3.bf16.msra.mxu0 %v4052_v10  ;;  %v3267_v10 = vpack.c.bf16 %v4219_v20, %v4206_v8  ;;  %v4318_v8 = vld [vmem:[#allocation7 + $0x28] sm:$0xff]  ;;  %v829_v20 = vand.u32 4294901760, %v4316_v1  ;;  %v4402_v31 = vsub.f32 %v804_v36, %v850_v2  ;;  %v4427_v36 = vsub.f32 %v808_v12, %v862_v15 }
  0x90   :  { %3256 = vmatprep.subr.bf16.mxu1 %v3255_v54  ;;  %3352 = vmatprep.subr.bf16.mxu0 %v4056_v13 }
  0x91   :  { %2659 = vmatprep.mubr.f32.mxu1 %v4083_v23  ;;  %2764 = vmatprep.mubr.f32.mxu0 %v4066_v17  ;;  %v3275_v17 = vpack.c.bf16 %v4249_v63, %v4241_v56  ;;  %v794_v23 = vld [vmem:[#allocation7 + $0x8] sm:$0xff]  ;;  %v4332_v56 = vld [vmem:[#allocation7 + $0x38] sm:$0xff]  ;;  %v803_v63 = vld [vmem:[#allocation7 + $0x50] sm:$0xff] }
  0x92   :  { %v820_v49 = vand.u32 4294901760, %v794_v23  ;;  %v838_v35 = vand.u32 4294901760, %v4332_v56  ;;  %v847_v41 = vand.u32 4294901760, %v803_v63 }
  0x93   :  { %3258 = vmatpush3.bf16.msra.mxu1 %v3255_v54  ;;  %3354 = vmatpush3.bf16.msra.mxu0 %v4056_v13  ;;  %v3271_v13 = vpack.c.bf16 %v4234_v22, %v4225_v30  ;;  %v832_v30 = vand.u32 4294901760, %v4318_v8  ;;  %v4330_v22 = vld [vmem:[#allocation7 + $0x30] sm:$0xff] }
  0x94   :  { %3260 = vmatprep.subr.bf16.mxu1 %v3259_v38  ;;  %3356 = vmatprep.subr.bf16.mxu0 %v4074_v18  ;;  %v835_v29 = vand.u32 4294901760, %v4330_v22  ;;  %v4361_v3 = vpack.c.bf16 %v850_v2, %v847_v41  ;;  %v4369_v9 = vsub.f32 %v794_v23, %v820_v49  ;;  %v4400_v28 = vsub.f32 %v803_v63, %v847_v41 }
  0x95   :  { %v4414_v23 = vsub.f32 %v805_v4, %v853_v6  ;;  %v4425_v63 = vsub.f32 %v807_v11, %v859_v14 }
  0x96   :  { %v927_v43 = vand.u32 4294901760, %v4369_v9 }
  0x97   :  { %3262 = vmatpush3.bf16.msra.mxu1 %v3259_v38  ;;  %3358 = vmatpush3.bf16.msra.mxu0 %v4074_v18  ;;  %v793_v18 = vld [vmem:[#allocation7] sm:$0xff]  ;;  %v985_v38 = vand.u32 4294901760, %v984_v48  ;;  %v5008_v4 = vand.u32 4294901760, %v4425_v63  ;;  %v4462_v48 = vpack.c.bf16 %v4427_v36, %v4425_v63 }
  0x98   :  { %3264 = vmatprep.subr.bf16.mxu1 %v3263_v39  ;;  %3360 = vmatprep.subr.bf16.mxu0 %v4094_v25  ;;  %v817_v45 = vand.u32 4294901760, %v793_v18  ;;  %v928_v51 = vsub.f32 %v4369_v9, %v927_v43 }
  0x9a   :  { %v4312_v59 = vpack.c.bf16 %v820_v49, %v817_v45  ;;  %v929_v21 = vand.u32 4294901760, %v928_v51 }
  0x9b   :  { %3266 = vmatpush3.bf16.msra.mxu1 %v3263_v39  ;;  %3362 = vmatpush3.bf16.msra.mxu0 %v4094_v25  ;;  %v3279_v25 = vpack.c.bf16 %v4265_v7, %v4260_v42  ;;  %v4365_v42 = vpack.c.bf16 %v856_v37, %v853_v6  ;;  %v4367_v7 = vsub.f32 %v793_v18, %v817_v45  ;;  %v990_v39 = vand.u32 4294901760, %v4400_v28 }
  0x9c   :  { %3268 = vmatprep.subr.bf16.mxu1 %v3267_v10  ;;  %3364 = vmatprep.subr.bf16.mxu0 %v4112_v34 }
  0x9d   :  { %v920_v16 = vand.u32 4294901760, %v4367_v7  ;;  %v4446_v51 = vpack.c.bf16 %v4369_v9, %v4367_v7 }
  0x9f   :  { %3270 = vmatpush3.bf16.msra.mxu1 %v3267_v10  ;;  %3366 = vmatpush3.bf16.msra.mxu0 %v4112_v34  ;;  %v4306_v34 = vld [vmem:[#allocation7 + $0x10] sm:$0xff]  ;;  %v921_v44 = vsub.f32 %v4367_v7, %v920_v16  ;;  %v5011_v10 = vand.u32 4294901760, %v4402_v31 }
  0xa0   :  { %3272 = vmatprep.subr.bf16.mxu1 %v3271_v13  ;;  %3368 = vmatprep.subr.bf16.mxu0 %v4141_v46 }
  0xa1   :  { %v922_v19 = vand.u32 4294901760, %v921_v44  ;;  %v998_v18 = vsub.f32 %v4402_v31, %v5011_v10 }
  0xa3   :  { %3274 = vmatpush3.bf16.msra.mxu1 %v3271_v13  ;;  %3370 = vmatpush3.bf16.msra.mxu0 %v4141_v46  ;;  %v823_v46 = vand.u32 4294901760, %v4306_v34  ;;  %v4385_v24 = vpack.c.bf16 %v929_v21, %v922_v19  ;;  %v999_v49 = vand.u32 4294901760, %v998_v18  ;;  %v4454_v21 = vpack.c.bf16 %v4402_v31, %v4400_v28 }
  0xa4   :  { %3276 = vmatprep.subr.bf16.mxu1 %v3275_v17  ;;  %3372 = vmatprep.subr.bf16.mxu0 %v4159_v53 }
  0xa5   :  { %v4470_v18 = vsub.f32 %v4306_v34, %v823_v46  ;;  %v4482_v34 = vsub.f32 %v4316_v1, %v829_v20 }
  0xa7   :  { %3278 = vmatpush3.bf16.msra.mxu1 %v3275_v17  ;;  %3374 = vmatpush3.bf16.msra.mxu0 %v4159_v53  ;;  %v4326_v53 = vpack.c.bf16 %v826_v0, %v823_v46  ;;  %v991_v17 = vsub.f32 %v4400_v28, %v990_v39  ;;  %v1513_v28 = vld [vmem:[#allocation8 + $0x58] sm:$0xff] }
  0xa8   :  { %3280 = vmatprep.subr.bf16.mxu1 %v3279_v25  ;;  %3376 = vmatprep.subr.bf16.mxu0 %v4181_v60 }
  0xa9   :  { %v992_v45 = vand.u32 4294901760, %v991_v17 }
  0xab   :  { %3282 = vmatpush3.bf16.msra.mxu1 %v3279_v25  ;;  %3378 = vmatpush3.bf16.msra.mxu0 %v4181_v60  ;;  %v4342_v60 = vpack.c.bf16 %v832_v30, %v829_v20  ;;  %v4416_v25 = vsub.f32 %v806_v5, %v856_v37  ;;  %v5007_v5 = vand.u32 4294901760, %v4427_v36  ;;  %v1019_v37 = vsub.f32 %v4425_v63, %v5008_v4 }
  0xac   :  { %3380 = vmatprep.subr.bf16.mxu1 %v4312_v59  ;;  %v948_v20 = vand.u32 4294901760, %v4482_v34 }
  0xad   :  { %v5009_v57 = vand.u32 4294901760, %v4416_v25  ;;  %v1026_v11 = vsub.f32 %v4427_v36, %v5007_v5  ;;  %v1020_v14 = vand.u32 4294901760, %v1019_v37 }
  0xae   :  { %2660 = vmatmul.mubr.f32.vlgmr.msra.gmra.mrb[0].mxu1 %v4151_v52  ;;  %2765 = vmatmul.mubr.f32.vlgmr.msra.gmra.mrb[0].mxu0 %v4123_v40  ;;  %v4352_v40 = vpack.c.bf16 %v838_v35, %v835_v29  ;;  %v801_v52 = vld [vmem:[#allocation7 + $0x40] sm:$0xff] }
  0xaf   :  { %3382 = vmatpush3.bf16.msra.mxu1 %v4312_v59  ;;  %v841_v58 = vand.u32 4294901760, %v801_v52  ;;  %v1012_v41 = vsub.f32 %v4416_v25, %v5009_v57  ;;  %v1027_v15 = vand.u32 4294901760, %v1026_v11  ;;  %v934_v11 = vand.u32 4294901760, %v4470_v18 }
  0xb0   :  { %3384 = vmatprep.subr.bf16.mxu1 %v4326_v53 }
  0xb1   :  { %v4357_v61 = vpack.c.bf16 %v844_v62, %v841_v58  ;;  %v4388_v26 = vsub.f32 %v801_v52, %v841_v58  ;;  %v5010_v52 = vand.u32 4294901760, %v4414_v23  ;;  %v4420_v58 = vpack.c.bf16 %v999_v49, %v992_v45 }
  0xb2   :  { %v1013_v6 = vand.u32 4294901760, %v1012_v41  ;;  %v4442_v44 = vpack.c.bf16 %v1027_v15, %v1020_v14  ;;  %v4475_v45 = vsub.f32 %v4308_v55, %v826_v0  ;;  %v4487_v55 = vsub.f32 %v4318_v8, %v832_v30 }
  0xb3   :  { %3386 = vmatpush3.bf16.msra.mxu1 %v4326_v53  ;;  %v976_v33 = vand.u32 4294901760, %v4388_v26  ;;  %v1005_v62 = vsub.f32 %v4414_v23, %v5010_v52  ;;  %v4450_v19 = vpack.c.bf16 %v4390_v32, %v4388_v26  ;;  %v4507_v30 = vsub.f32 %v4330_v22, %v835_v29 }
  0xb4   :  { %3388 = vmatprep.subr.bf16.mxu1 %v4342_v60  ;;  %v941_v14 = vand.u32 4294901760, %v4475_v45  ;;  %v955_v8 = vand.u32 4294901760, %v4487_v55  ;;  %v5024_v32 = vand.u32 4294901760, %v4427_v36 }
  0xb5   :  { %v977_v47 = vsub.f32 %v4388_v26, %v976_v33  ;;  %v1006_v2 = vand.u32 4294901760, %v1005_v62  ;;  %v962_v29 = vand.u32 4294901760, %v4507_v30  ;;  %v5023_v26 = vand.u32 4294901760, %v4425_v63 }
  0xb6   :  { %v942_v1 = vsub.f32 %v4475_v45, %v941_v14  ;;  %v3515_v7 = vpack.c.bf16 %v955_v8, %v948_v20 }
  0xb7   :  { %3390 = vmatpush3.bf16.msra.mxu1 %v4342_v60  ;;  %v978_v54 = vand.u32 4294901760, %v977_v47  ;;  %v4440_v12 = vpack.c.bf16 %v1013_v6, %v1006_v2  ;;  %v4458_v47 = vpack.c.bf16 %v4416_v25, %v4414_v23  ;;  %v963_v52 = vsub.f32 %v4507_v30, %v962_v29 }
  0xb8   :  { %3392 = vmatprep.subr.bf16.mxu1 %v4352_v40 }
  0xb9   :  { %v4406_v13 = vpack.c.bf16 %v985_v38, %v978_v54  ;;  %v2230_v54 = vld [vmem:[%s5001_s2] ss:$0 sm:$0xff] }
  0xbb   :  { %3394 = vmatpush3.bf16.msra.mxu1 %v4352_v40 }
  0xbc   :  { %3396 = vmatprep.subr.bf16.mxu1 %v4357_v61 }
  0xbf   :  { %3398 = vmatpush3.bf16.msra.mxu1 %v4357_v61 }
  0xc0   :  { %3400 = vmatprep.subr.bf16.mxu1 %v4361_v3 }
  0xc3   :  { %3402 = vmatpush3.bf16.msra.mxu1 %v4361_v3 }
  0xc4   :  { %3404 = vmatprep.subr.bf16.mxu1 %v4365_v42 }
  0xc7   :  { %3406 = vmatpush3.bf16.msra.mxu1 %v4365_v42 }
  0xc8   :  { %3408 = vmatprep.subr.bf16.mxu1 %v4375_v50 }
  0xcb   :  { %3410 = vmatpush3.bf16.msra.mxu1 %v4375_v50 }
  0xcc   :  { %3412 = vmatprep.subr.bf16.mxu1 %v4385_v24 }
 0x181   :  { %v2661_v38 = vpop.f32.mrb[0].mxu1  ;;  %v2766_v17 = vpop.f32.mrb[0].mxu0 }
 0x182   :  { %v3763_v49 = vadd.f32 %v2661_v38, %v2230_v54  ;;  %v465_v62 = vpop.f32.mrb[1].mxu1  ;;  %v781_v41 = vpop.f32.mrb[1].mxu0  ;;  %v935_v38 = vsub.f32 %v4470_v18, %v934_v11 }
 0x183   :  { %v3765_v2 = vadd.f32 %v2230_v54, %v465_v62 }
 0x184   :  { %v3764_v6 = vadd.f32 %v3763_v49, %v2766_v17  ;;  %v4512_v49 = vsub.f32 %v4332_v56, %v838_v35  ;;  %v956_v56 = vsub.f32 %v4487_v55, %v955_v8 }
 0x185   :  { %v3766_v37 = vadd.f32 %v3765_v2, %v781_v41 }
 0x186   :  { %v792_v46 = vmax.f32 %v3764_v6, 0.0  ;;  %v936_v6 = vand.u32 4294901760, %v935_v38  ;;  %v969_v35 = vand.u32 4294901760, %v4512_v49  ;;  %v957_v57 = vand.u32 4294901760, %v956_v56 }
 0x187   :  { %v791_v0 = vmax.f32 %v3766_v37, 0.0  ;;  %v943_v37 = vand.u32 4294901760, %v942_v1 }
 0x188   :  { %v4489_v15 = vand.u32 4294901760, %v792_v46  ;;  %v970_v10 = vsub.f32 %v4512_v49, %v969_v35  ;;  %v3519_v9 = vpack.c.bf16 %v969_v35, %v962_v29 }
 0x189   :  { %v4491_v54 = vand.u32 4294901760, %v791_v0  ;;  %v3415_v1 = vpack.c.bf16 %v943_v37, %v936_v6  ;;  %v964_v6 = vand.u32 4294901760, %v963_v52  ;;  %v4557_v52 = vld [vmem:[#allocation8 + $0x10] sm:$0xff] }
 0x18a   :  { %v4501_v17 = vsub.f32 %v792_v46, %v4489_v15  ;;  %v949_v46 = vsub.f32 %v4482_v34, %v948_v20  ;;  %v971_v37 = vand.u32 4294901760, %v970_v10  ;;  %v4553_v10 = vld [vmem:[#allocation8] sm:$0xff] }
 0x18b   :  { %v4515_v62 = vsub.f32 %v791_v0, %v4491_v54 }
 0x18c   :  { %v909_v41 = vand.u32 4294901760, %v4501_v17  ;;  %v950_v5 = vand.u32 4294901760, %v949_v46  ;;  %v3423_v46 = vpack.c.bf16 %v971_v37, %v964_v6  ;;  %v4587_v6 = vld [vmem:[#allocation8 + $0x30] sm:$0xff]  ;;  %v4589_v37 = vld [vmem:[#allocation8 + $0x38] sm:$0xff] }
 0x18d   :  { %v899_v2 = vand.u32 4294901760, %v4515_v62 }
 0x18e   :  { %v910_v22 = vsub.f32 %v4501_v17, %v909_v41 }
 0x18f   :  { %v900_v0 = vsub.f32 %v4515_v62, %v899_v2 }
 0x190   :  { %v911_v4 = vand.u32 4294901760, %v910_v22  ;;  %v3451_v22 = vpack.c.bf16 %v4487_v55, %v4482_v34  ;;  %v1516_v34 = vld [vmem:[#allocation8 + $0x70] sm:$0xff]  ;;  %v1517_v55 = vld [vmem:[#allocation8 + $0x78] sm:$0xff] }
 0x191   :  { %v901_v38 = vand.u32 4294901760, %v900_v0  ;;  %v3419_v0 = vpack.c.bf16 %v957_v57, %v950_v5  ;;  %v1526_v57 = vand.u32 4294901760, %v4553_v10  ;;  %v5013_v5 = vand.u32 4294901760, %v4557_v52 }
 0x193   :  { %2799 = vmatprep.mubr.f32.mxu1 %v901_v38  ;;  %v4709_v36 = vsub.f32 %v4553_v10, %v1526_v57 }
 0x194   :  { %2800 = vmatmul.mubr.f32.vlgmr.msra.gmra.mrb[2].mxu1 %v911_v4  ;;  %v4563_v4 = vld [vmem:[#allocation8 + $0x18] sm:$0xff] }
 0x195   :  { %3414 = vmatpush3.bf16.msra.mxu1 %v4385_v24  ;;  %2834 = vmatprep.mubr.f32.mxu1 %v4491_v54  ;;  %v3447_v24 = vpack.c.bf16 %v4475_v45, %v4470_v18  ;;  %v5022_v18 = vand.u32 4294901760, %v4416_v25  ;;  %v1629_v20 = vand.u32 4294901760, %v4709_v36 }
 0x196   :  { %3416 = vmatprep.subr.bf16.mxu1 %v3415_v1 }
 0x199   :  { %3418 = vmatpush3.bf16.msra.mxu1 %v3415_v1 }
 0x19a   :  { %3420 = vmatprep.subr.bf16.mxu1 %v3419_v0 }
 0x19d   :  { %3422 = vmatpush3.bf16.msra.mxu1 %v3419_v0 }
 0x19e   :  { %3424 = vmatprep.subr.bf16.mxu1 %v3423_v46 }
 0x1a1   :  { %3426 = vmatpush3.bf16.msra.mxu1 %v3423_v46  ;;  %v3455_v46 = vpack.c.bf16 %v4512_v49, %v4507_v30  ;;  %v1630_v30 = vsub.f32 %v4709_v36, %v1629_v20 }
 0x1a2   :  { %3428 = vmatprep.subr.bf16.mxu1 %v4406_v13 }
 0x1a5   :  { %3430 = vmatpush3.bf16.msra.mxu1 %v4406_v13  ;;  %v4555_v13 = vld [vmem:[#allocation8 + $0x8] sm:$0xff] }
 0x1a6   :  { %3432 = vmatprep.subr.bf16.mxu1 %v4420_v58 }
 0x1a9   :  { %3434 = vmatpush3.bf16.msra.mxu1 %v4420_v58  ;;  %v5014_v58 = vand.u32 4294901760, %v4555_v13 }
 0x1aa   :  { %3436 = vmatprep.subr.bf16.mxu1 %v4440_v12 }
 0x1ab   :  { %v4577_v56 = vpack.c.bf16 %v5014_v58, %v1526_v57 }
 0x1ad   :  { %3438 = vmatpush3.bf16.msra.mxu1 %v4440_v12  ;;  %v4566_v12 = vld [vmem:[#allocation8 + $0x20] sm:$0xff]  ;;  %3572 = vmatprep.subr.bf16.mxu0 %v4577_v56 }
 0x1ae   :  { %3440 = vmatprep.subr.bf16.mxu1 %v4442_v44  ;;  %v1538_v38 = vand.u32 4294901760, %v4566_v12  ;;  %3574 = vmatpush3.bf16.msra.mxu0 %v4577_v56 }
 0x1b1   :  { %3442 = vmatpush3.bf16.msra.mxu1 %v4442_v44  ;;  %v4568_v44 = vld [vmem:[#allocation8 + $0x28] sm:$0xff] }
 0x1b2   :  { %3444 = vmatprep.subr.bf16.mxu1 %v4446_v51  ;;  %v1541_v1 = vand.u32 4294901760, %v4568_v44 }
 0x1b4   :  { %2835 = vmatmul.mubr.f32.vlgmr.msra.gmra.mrb[2].mxu1 %v4489_v15 }
 0x1b5   :  { %3446 = vmatpush3.bf16.msra.mxu1 %v4446_v51  ;;  %2869 = vmatprep.mubr.f32.mxu1 %v4515_v62  ;;  %v5012_v51 = vand.u32 4294901760, %v4563_v4  ;;  %v1631_v62 = vand.u32 4294901760, %v1630_v30 }
 0x1b6   :  { %3448 = vmatprep.subr.bf16.mxu1 %v3447_v24 }
 0x1b7   :  { %v4585_v0 = vpack.c.bf16 %v5012_v51, %v5013_v5  ;;  %v4600_v51 = vpack.c.bf16 %v1541_v1, %v1538_v38  ;;  %v1544_v5 = vand.u32 4294901760, %v4587_v6 }
 0x1b9   :  { %3450 = vmatpush3.bf16.msra.mxu1 %v3447_v24  ;;  %3576 = vmatprep.subr.bf16.mxu0 %v4585_v0  ;;  %v1547_v24 = vand.u32 4294901760, %v4589_v37 }
 0x1ba   :  { %3452 = vmatprep.subr.bf16.mxu1 %v3451_v22  ;;  %3578 = vmatpush3.bf16.msra.mxu0 %v4585_v0 }
 0x1bb   :  { %3580 = vmatprep.subr.bf16.mxu0 %v4600_v51  ;;  %v4610_v58 = vpack.c.bf16 %v1547_v24, %v1544_v5 }
 0x1bd   :  { %3454 = vmatpush3.bf16.msra.mxu1 %v3451_v22 }
 0x1be   :  { %3456 = vmatprep.subr.bf16.mxu1 %v3455_v46  ;;  %3582 = vmatpush3.bf16.msra.mxu0 %v4600_v51 }
 0x1bf   :  { %3584 = vmatprep.subr.bf16.mxu0 %v4610_v58 }
 0x1c1   :  { %3458 = vmatpush3.bf16.msra.mxu1 %v3455_v46 }
 0x1c2   :  { %3460 = vmatprep.subr.bf16.mxu1 %v4450_v19  ;;  %3586 = vmatpush3.bf16.msra.mxu0 %v4610_v58 }
 0x1c5   :  { %3462 = vmatpush3.bf16.msra.mxu1 %v4450_v19  ;;  %v3507_v19 = vpack.c.bf16 %v927_v43, %v920_v16  ;;  %v3523_v16 = vpack.c.bf16 %v983_v27, %v976_v33  ;;  %v5020_v43 = vand.u32 4294901760, %v4402_v31  ;;  %v3535_v33 = vpack.c.bf16 %v5024_v32, %v5023_v26 }
 0x1c6   :  { %3464 = vmatprep.subr.bf16.mxu1 %v4454_v21  ;;  %v1559_v31 = vand.u32 4294901760, %v1513_v28 }
 0x1c9   :  { %3466 = vmatpush3.bf16.msra.mxu1 %v4454_v21  ;;  %v3511_v21 = vpack.c.bf16 %v941_v14, %v934_v11  ;;  %v5025_v11 = vand.u32 4294901760, %v4555_v13 }
 0x1ca   :  { %3468 = vmatprep.subr.bf16.mxu1 %v4458_v47 }
 0x1cb   :  { %v4714_v14 = vsub.f32 %v4555_v13, %v5025_v11 }
 0x1cd   :  { %3470 = vmatpush3.bf16.msra.mxu1 %v4458_v47  ;;  %v3527_v47 = vpack.c.bf16 %v5020_v43, %v990_v39  ;;  %v1514_v39 = vld [vmem:[#allocation8 + $0x60] sm:$0xff] }
 0x1ce   :  { %3472 = vmatprep.subr.bf16.mxu1 %v4462_v48 }
 0x1d1   :  { %3474 = vmatpush3.bf16.msra.mxu1 %v4462_v48  ;;  %v5021_v48 = vand.u32 4294901760, %v4414_v23  ;;  %v1562_v23 = vand.u32 4294901760, %v1514_v39 }
 0x1d2   :  { %3476 = vmatprep.subr.bf16.mxu1 %v4312_v59 }
 0x1d3   :  { %v3531_v45 = vpack.c.bf16 %v5022_v18, %v5021_v48  ;;  %v4759_v18 = vsub.f32 %v1514_v39, %v1562_v23 }
 0x1d4   :  { %2870 = vmatmul.mubr.f32.vlgmr.msra.gmra.mrb[2].mxu1 %v4501_v17  ;;  %v1636_v17 = vand.u32 4294901760, %v4714_v14 }
 0x1d5   :  { %3478 = vmatpush3.bf16.msra.mxu1 %v4312_v59  ;;  %2904 = vmatprep.mubr.f32.mxu1 %v899_v2 }
 0x1d6   :  { %3480 = vmatprep.subr.bf16.mxu1 %v4326_v53  ;;  %v1637_v49 = vsub.f32 %v4714_v14, %v1636_v17 }
 0x1d9   :  { %3482 = vmatpush3.bf16.msra.mxu1 %v4326_v53 }
 0x1da   :  { %3484 = vmatprep.subr.bf16.mxu1 %v4342_v60 }
 0x1dd   :  { %3486 = vmatpush3.bf16.msra.mxu1 %v4342_v60 }
 0x1de   :  { %3488 = vmatprep.subr.bf16.mxu1 %v4352_v40 }
 0x1e1   :  { %3490 = vmatpush3.bf16.msra.mxu1 %v4352_v40 }
 0x1e2   :  { %3492 = vmatprep.subr.bf16.mxu1 %v4357_v61 }
 0x1e5   :  { %3494 = vmatpush3.bf16.msra.mxu1 %v4357_v61 }
 0x1e6   :  { %3496 = vmatprep.subr.bf16.mxu1 %v4361_v3 }
 0x1e9   :  { %3498 = vmatpush3.bf16.msra.mxu1 %v4361_v3 }
 0x1ea   :  { %3500 = vmatprep.subr.bf16.mxu1 %v4365_v42 }
 0x1ed   :  { %3502 = vmatpush3.bf16.msra.mxu1 %v4365_v42 }
 0x1ee   :  { %3504 = vmatprep.subr.bf16.mxu1 %v4375_v50 }
 0x1f1   :  { %3506 = vmatpush3.bf16.msra.mxu1 %v4375_v50 }
 0x1f2   :  { %3508 = vmatprep.subr.bf16.mxu1 %v3507_v19 }
 0x1f4   :  { %2905 = vmatmul.mubr.f32.vlgmr.msra.gmra.mrb[2].mxu1 %v909_v41  ;;  %v1638_v41 = vand.u32 4294901760, %v1637_v49 }
 0x1f5   :  { %3510 = vmatpush3.bf16.msra.mxu1 %v3507_v19  ;;  %2939 = vmatprep.mubr.f32.mxu1 %v4491_v54  ;;  %v4747_v19 = vsub.f32 %v1513_v28, %v1559_v31 }
 0x1f6   :  { %3512 = vmatprep.subr.bf16.mxu1 %v3511_v21  ;;  %v4730_v2 = vpack.c.bf16 %v1638_v41, %v1631_v62 }
 0x1f9   :  { %3514 = vmatpush3.bf16.msra.mxu1 %v3511_v21 }
 0x1fa   :  { %3516 = vmatprep.subr.bf16.mxu1 %v3515_v7 }
 0x1fd   :  { %3518 = vmatpush3.bf16.msra.mxu1 %v3515_v7 }
 0x1fe   :  { %3520 = vmatprep.subr.bf16.mxu1 %v3519_v9 }
 0x201   :  { %3522 = vmatpush3.bf16.msra.mxu1 %v3519_v9 }
 0x202   :  { %3524 = vmatprep.subr.bf16.mxu1 %v3523_v16 }
 0x205   :  { %3526 = vmatpush3.bf16.msra.mxu1 %v3523_v16  ;;  %v5019_v16 = vand.u32 4294901760, %v4747_v19 }
 0x206   :  { %3528 = vmatprep.subr.bf16.mxu1 %v3527_v47 }
 0x207   :  { %v1707_v48 = vsub.f32 %v4747_v19, %v5019_v16 }
 0x209   :  { %3530 = vmatpush3.bf16.msra.mxu1 %v3527_v47  ;;  %v1708_v32 = vand.u32 4294901760, %v1707_v48 }
 0x20a   :  { %3532 = vmatprep.subr.bf16.mxu1 %v3531_v45 }
 0x20d   :  { %3534 = vmatpush3.bf16.msra.mxu1 %v3531_v45 }
 0x20e   :  { %3536 = vmatprep.subr.bf16.mxu1 %v3535_v33 }
 0x211   :  { %3538 = vmatpush3.bf16.msra.mxu1 %v3535_v33  ;;  %v5018_v33 = vand.u32 4294901760, %v4759_v18 }
 0x212   :  { %3540 = vmatprep.subr.bf16.mxu1 %v4312_v59 }
 0x214   :  { %2940 = vmatmul.mubr.f32.vlgmr.msra.gmra.mrb[2].mxu1 %v4489_v15 }
 0x215   :  { %3542 = vmatpush3.bf16.msra.mxu1 %v4312_v59  ;;  %2974 = vmatprep.mubr.f32.mxu1 %v4491_v54  ;;  %v1510_v59 = vld [vmem:[#allocation8 + $0x40] sm:$0xff]  ;;  %v1571_v54 = vand.u32 4294901760, %v1517_v55 }
 0x216   :  { %3544 = vmatprep.subr.bf16.mxu1 %v4326_v53 }
 0x219   :  { %3546 = vmatpush3.bf16.msra.mxu1 %v4326_v53  ;;  %v1511_v53 = vld [vmem:[#allocation8 + $0x48] sm:$0xff] }
 0x21a   :  { %3548 = vmatprep.subr.bf16.mxu1 %v4342_v60 }
 0x21d   :  { %3550 = vmatpush3.bf16.msra.mxu1 %v4342_v60  ;;  %v1550_v60 = vand.u32 4294901760, %v1510_v59 }
 0x21e   :  { %3552 = vmatprep.subr.bf16.mxu1 %v4352_v40 }
 0x21f   :  { %v4733_v29 = vsub.f32 %v1510_v59, %v1550_v60 }
 0x221   :  { %3554 = vmatpush3.bf16.msra.mxu1 %v4352_v40  ;;  %v1553_v40 = vand.u32 4294901760, %v1511_v53  ;;  %v1685_v10 = vand.u32 4294901760, %v4733_v29 }
 0x222   :  { %3556 = vmatprep.subr.bf16.mxu1 %v4357_v61 }
 0x223   :  { %v4696_v27 = vpack.c.bf16 %v1553_v40, %v1550_v60  ;;  %v4735_v35 = vsub.f32 %v1511_v53, %v1553_v40  ;;  %v1686_v57 = vsub.f32 %v4733_v29, %v1685_v10  ;;  %v1714_v60 = vsub.f32 %v4759_v18, %v5018_v33 }
 0x225   :  { %3558 = vmatpush3.bf16.msra.mxu1 %v4357_v61  ;;  %v1512_v61 = vld [vmem:[#allocation8 + $0x50] sm:$0xff]  ;;  %3588 = vmatprep.subr.bf16.mxu0 %v4696_v27  ;;  %v1692_v13 = vand.u32 4294901760, %v4735_v35  ;;  %v1687_v21 = vand.u32 4294901760, %v1686_v57  ;;  %v4795_v30 = vpack.c.bf16 %v4735_v35, %v4733_v29 }
 0x226   :  { %3560 = vmatprep.subr.bf16.mxu1 %v4361_v3  ;;  %3590 = vmatpush3.bf16.msra.mxu0 %v4696_v27  ;;  %v2231_v57 = vld [vmem:[%s5003_s4] ss:$0 sm:$0xff] }
 0x227   :  { %v1693_v22 = vsub.f32 %v4735_v35, %v1692_v13 }
 0x229   :  { %3562 = vmatpush3.bf16.msra.mxu1 %v4361_v3  ;;  %v1556_v3 = vand.u32 4294901760, %v1512_v61  ;;  %v1694_v7 = vand.u32 4294901760, %v1693_v22  ;;  %v5026_v22 = vand.u32 4294901760, %v4557_v52 }
 0x22a   :  { %3564 = vmatprep.subr.bf16.mxu1 %v4365_v42 }
 0x22b   :  { %v4745_v46 = vsub.f32 %v1512_v61, %v1556_v3  ;;  %v4751_v43 = vpack.c.bf16 %v1694_v7, %v1687_v21  ;;  %v4772_v61 = vsub.f32 %v1517_v55, %v1571_v54  ;;  %v4815_v21 = vsub.f32 %v4557_v52, %v5026_v22 }
 0x22c   :  { %v5027_v7 = vand.u32 4294901760, %v4563_v4  ;;  %v4857_v22 = vsub.f32 %v4589_v37, %v1547_v24 }
 0x22d   :  { %3566 = vmatpush3.bf16.msra.mxu1 %v4365_v42  ;;  %v4700_v42 = vpack.c.bf16 %v1559_v31, %v1556_v3  ;;  %v1699_v9 = vand.u32 4294901760, %v4745_v46  ;;  %v1715_v3 = vand.u32 4294901760, %v1714_v60  ;;  %v5015_v39 = vand.u32 4294901760, %v4772_v61 }
 0x22e   :  { %3568 = vmatprep.subr.bf16.mxu1 %v4375_v50  ;;  %v4799_v49 = vpack.c.bf16 %v4747_v19, %v4745_v46  ;;  %v1678_v24 = vand.u32 4294901760, %v4857_v22  ;;  %v5032_v35 = vand.u32 4294901760, %v4772_v61 }
 0x22f   :  { %3592 = vmatprep.subr.bf16.mxu0 %v4700_v42  ;;  %v1700_v47 = vsub.f32 %v4745_v46, %v1699_v9 }
 0x230   :  { %3594 = vmatpush3.bf16.msra.mxu0 %v4700_v42  ;;  %v1679_v16 = vsub.f32 %v4857_v22, %v1678_v24 }
 0x231   :  { %3570 = vmatpush3.bf16.msra.mxu1 %v4375_v50  ;;  %v1515_v50 = vld [vmem:[#allocation8 + $0x68] sm:$0xff]  ;;  %v1701_v26 = vand.u32 4294901760, %v1700_v47  ;;  %v4820_v47 = vsub.f32 %v4563_v4, %v5027_v7 }
 0x232   :  { %v1565_v25 = vand.u32 4294901760, %v1515_v50 }
 0x233   :  { %v4765_v53 = vpack.c.bf16 %v1708_v32, %v1701_v26 }
 0x234   :  { %2975 = vmatmul.mubr.f32.vlgmr.msra.gmra.mrb[2].mxu1 %v4489_v15  ;;  %v4704_v63 = vpack.c.bf16 %v1565_v25, %v1562_v23  ;;  %v1568_v15 = vand.u32 4294901760, %v1516_v34  ;;  %v4761_v45 = vsub.f32 %v1515_v50, %v1565_v25  ;;  %v1735_v25 = vsub.f32 %v4772_v61, %v5015_v39 }
 0x236   :  { %3596 = vmatprep.subr.bf16.mxu0 %v4704_v63  ;;  %v4720_v8 = vpack.c.bf16 %v1571_v54, %v1568_v15  ;;  %v5017_v59 = vand.u32 4294901760, %v4761_v45  ;;  %v4770_v40 = vsub.f32 %v1516_v34, %v1568_v15  ;;  %v1736_v55 = vand.u32 4294901760, %v1735_v25 }
 0x237   :  { %3598 = vmatpush3.bf16.msra.mxu0 %v4704_v63  ;;  %v4791_v54 = vpack.c.bf16 %v4714_v14, %v4709_v36  ;;  %v4803_v62 = vpack.c.bf16 %v4761_v45, %v4759_v18 }
 0x238   :  { %3600 = vmatprep.subr.bf16.mxu0 %v4720_v8  ;;  %v1721_v28 = vsub.f32 %v4761_v45, %v5017_v59  ;;  %v5016_v31 = vand.u32 4294901760, %v4770_v40  ;;  %v4807_v41 = vpack.c.bf16 %v4772_v61, %v4770_v40  ;;  %v5031_v29 = vand.u32 4294901760, %v4770_v40 }
 0x23a   :  { %v1722_v50 = vand.u32 4294901760, %v1721_v28  ;;  %v1728_v23 = vsub.f32 %v4770_v40, %v5016_v31  ;;  %v1643_v28 = vand.u32 4294901760, %v4815_v21 }
 0x23b   :  { %3602 = vmatpush3.bf16.msra.mxu0 %v4720_v8 }
 0x23c   :  { %3604 = vmatprep.subr.bf16.mxu0 %v4730_v2  ;;  %v4785_v11 = vpack.c.bf16 %v1722_v50, %v1715_v3  ;;  %v1729_v34 = vand.u32 4294901760, %v1728_v23  ;;  %v1650_v3 = vand.u32 4294901760, %v4820_v47  ;;  %v4827_v50 = vsub.f32 %v4566_v12, %v1538_v38 }
 0x23d   :  { %v4832_v23 = vsub.f32 %v4568_v44, %v1541_v1  ;;  %v4852_v1 = vsub.f32 %v4587_v6, %v1544_v5 }
 0x23e   :  { %v4787_v15 = vpack.c.bf16 %v1736_v55, %v1729_v34  ;;  %v1644_v55 = vsub.f32 %v4815_v21, %v1643_v28  ;;  %v1651_v12 = vsub.f32 %v4820_v47, %v1650_v3  ;;  %v1657_v38 = vand.u32 4294901760, %v4827_v50 }
 0x23f   :  { %v1664_v44 = vand.u32 4294901760, %v4832_v23  ;;  %v1671_v37 = vand.u32 4294901760, %v4852_v1 }
 0x241   :  { %v1665_v6 = vsub.f32 %v4832_v23, %v1664_v44  ;;  %v1672_v33 = vsub.f32 %v4852_v1, %v1671_v37  ;;  %v3707_v36 = vpack.c.bf16 %v1664_v44, %v1657_v38  ;;  %v3711_v14 = vpack.c.bf16 %v1678_v24, %v1671_v37 }
 0x243   :  { %v1666_v59 = vand.u32 4294901760, %v1665_v6 }
 0x307   :  { %v2976_v48 = vpop.f32.mrb[2].mxu1 }
 0x308   :  { %v3767_v26 = vadd.f32 %v2976_v48, %v2231_v57  ;;  %v1490_v32 = vpop.f32.mrb[3].mxu1 }
 0x309   :  { %v3768_v60 = vadd.f32 %v2231_v57, %v1490_v32  ;;  %v1645_v32 = vand.u32 4294901760, %v1644_v55 }
 0x30a   :  { %v1501_v52 = vmax.f32 %v3767_v26, 0.0 }
 0x30b   :  { %v1500_v4 = vmax.f32 %v3768_v60, 0.0  ;;  %v1652_v60 = vand.u32 4294901760, %v1651_v12 }
 0x30c   :  { %v4834_v25 = vand.u32 4294901760, %v1501_v52 }
 0x30d   :  { %v4836_v34 = vand.u32 4294901760, %v1500_v4  ;;  %v3607_v12 = vpack.c.bf16 %v1652_v60, %v1645_v32  ;;  %v1673_v32 = vand.u32 4294901760, %v1672_v33  ;;  %v1680_v60 = vand.u32 4294901760, %v1679_v16 }
 0x30e   :  { %v4846_v57 = vsub.f32 %v1501_v52, %v4834_v25  ;;  %v1658_v52 = vsub.f32 %v4827_v50, %v1657_v38  ;;  %v3643_v16 = vpack.c.bf16 %v4832_v23, %v4827_v50  ;;  %v3699_v33 = vpack.c.bf16 %v1636_v17, %v1629_v20 }
 0x30f   :  { %v4860_v7 = vsub.f32 %v1500_v4, %v4836_v34  ;;  %v3715_v20 = vpack.c.bf16 %v1692_v13, %v1685_v10  ;;  %v5028_v17 = vand.u32 4294901760, %v4747_v19  ;;  %v3727_v10 = vpack.c.bf16 %v5032_v35, %v5031_v29 }
 0x310   :  { %v1618_v48 = vand.u32 4294901760, %v4846_v57  ;;  %v1659_v39 = vand.u32 4294901760, %v1658_v52  ;;  %v3615_v52 = vpack.c.bf16 %v1680_v60, %v1673_v32 }
 0x311   :  { %v1608_v26 = vand.u32 4294901760, %v4860_v7 }
 0x312   :  { %v1619_v5 = vsub.f32 %v4846_v57, %v1618_v48 }
 0x313   :  { %v1609_v4 = vsub.f32 %v4860_v7, %v1608_v26 }
 0x314   :  { %v1620_v31 = vand.u32 4294901760, %v1619_v5 }
 0x315   :  { %v1610_v55 = vand.u32 4294901760, %v1609_v4  ;;  %v3611_v4 = vpack.c.bf16 %v1666_v59, %v1659_v39  ;;  %v3703_v59 = vpack.c.bf16 %v1650_v3, %v1643_v28  ;;  %v5030_v39 = vand.u32 4294901760, %v4761_v45 }
 0x317   :  { %3009 = vmatprep.mubr.f32.mxu0 %v1610_v55 }
 0x318   :  { %3010 = vmatmul.mubr.f32.vlgmr.msra.gmra.mrb[2].mxu0 %v1620_v31  ;;  %v5029_v31 = vand.u32 4294901760, %v4759_v18 }
 0x319   :  { %3606 = vmatpush3.bf16.msra.mxu0 %v4730_v2  ;;  %3044 = vmatprep.mubr.f32.mxu0 %v4836_v34  ;;  %v3639_v2 = vpack.c.bf16 %v4820_v47, %v4815_v21 }
 0x31a   :  { %3608 = vmatprep.subr.bf16.mxu0 %v3607_v12 }
 0x31d   :  { %3610 = vmatpush3.bf16.msra.mxu0 %v3607_v12 }
 0x31e   :  { %3612 = vmatprep.subr.bf16.mxu0 %v3611_v4 }
 0x321   :  { %3614 = vmatpush3.bf16.msra.mxu0 %v3611_v4 }
 0x322   :  { %3616 = vmatprep.subr.bf16.mxu0 %v3615_v52 }
 0x325   :  { %3618 = vmatpush3.bf16.msra.mxu0 %v3615_v52 }
 0x326   :  { %3620 = vmatprep.subr.bf16.mxu0 %v4751_v43 }
 0x329   :  { %3622 = vmatpush3.bf16.msra.mxu0 %v4751_v43  ;;  %v3647_v43 = vpack.c.bf16 %v4857_v22, %v4852_v1 }
 0x32a   :  { %3624 = vmatprep.subr.bf16.mxu0 %v4765_v53 }
 0x32d   :  { %3626 = vmatpush3.bf16.msra.mxu0 %v4765_v53  ;;  %v3719_v53 = vpack.c.bf16 %v5028_v17, %v1699_v9 }
 0x32e   :  { %3628 = vmatprep.subr.bf16.mxu0 %v4785_v11 }
 0x331   :  { %3630 = vmatpush3.bf16.msra.mxu0 %v4785_v11  ;;  %v3723_v11 = vpack.c.bf16 %v5030_v39, %v5029_v31 }
 0x332   :  { %3632 = vmatprep.subr.bf16.mxu0 %v4787_v15 }
 0x335   :  { %3634 = vmatpush3.bf16.msra.mxu0 %v4787_v15 }
 0x336   :  { %3636 = vmatprep.subr.bf16.mxu0 %v4791_v54 }
 0x338   :  { %3045 = vmatmul.mubr.f32.vlgmr.msra.gmra.mrb[2].mxu0 %v4834_v25 }
 0x339   :  { %3638 = vmatpush3.bf16.msra.mxu0 %v4791_v54  ;;  %3079 = vmatprep.mubr.f32.mxu0 %v4860_v7 }
 0x33a   :  { %3640 = vmatprep.subr.bf16.mxu0 %v3639_v2 }
 0x33d   :  { %3642 = vmatpush3.bf16.msra.mxu0 %v3639_v2 }
 0x33e   :  { %3644 = vmatprep.subr.bf16.mxu0 %v3643_v16 }
 0x341   :  { %3646 = vmatpush3.bf16.msra.mxu0 %v3643_v16 }
 0x342   :  { %3648 = vmatprep.subr.bf16.mxu0 %v3647_v43 }
 0x345   :  { %3650 = vmatpush3.bf16.msra.mxu0 %v3647_v43 }
 0x346   :  { %3652 = vmatprep.subr.bf16.mxu0 %v4795_v30 }
 0x349   :  { %3654 = vmatpush3.bf16.msra.mxu0 %v4795_v30 }
 0x34a   :  { %3656 = vmatprep.subr.bf16.mxu0 %v4799_v49 }
 0x34d   :  { %3658 = vmatpush3.bf16.msra.mxu0 %v4799_v49 }
 0x34e   :  { %3660 = vmatprep.subr.bf16.mxu0 %v4803_v62 }
 0x351   :  { %3662 = vmatpush3.bf16.msra.mxu0 %v4803_v62 }
 0x352   :  { %3664 = vmatprep.subr.bf16.mxu0 %v4807_v41 }
 0x355   :  { %3666 = vmatpush3.bf16.msra.mxu0 %v4807_v41 }
 0x356   :  { %3668 = vmatprep.subr.bf16.mxu0 %v4577_v56 }
 0x358   :  { %3080 = vmatmul.mubr.f32.vlgmr.msra.gmra.mrb[2].mxu0 %v4846_v57 }
 0x359   :  { %3670 = vmatpush3.bf16.msra.mxu0 %v4577_v56  ;;  %3114 = vmatprep.mubr.f32.mxu0 %v1608_v26 }
 0x35a   :  { %3672 = vmatprep.subr.bf16.mxu0 %v4585_v0 }
 0x35d   :  { %3674 = vmatpush3.bf16.msra.mxu0 %v4585_v0 }
 0x35e   :  { %3676 = vmatprep.subr.bf16.mxu0 %v4600_v51 }
 0x361   :  { %3678 = vmatpush3.bf16.msra.mxu0 %v4600_v51 }
 0x362   :  { %3680 = vmatprep.subr.bf16.mxu0 %v4610_v58 }
 0x365   :  { %3682 = vmatpush3.bf16.msra.mxu0 %v4610_v58 }
 0x366   :  { %3684 = vmatprep.subr.bf16.mxu0 %v4696_v27 }
 0x369   :  { %3686 = vmatpush3.bf16.msra.mxu0 %v4696_v27 }
 0x36a   :  { %3688 = vmatprep.subr.bf16.mxu0 %v4700_v42 }
 0x36d   :  { %3690 = vmatpush3.bf16.msra.mxu0 %v4700_v42 }
 0x36e   :  { %3692 = vmatprep.subr.bf16.mxu0 %v4704_v63 }
 0x371   :  { %3694 = vmatpush3.bf16.msra.mxu0 %v4704_v63 }
 0x372   :  { %3696 = vmatprep.subr.bf16.mxu0 %v4720_v8 }
 0x375   :  { %3698 = vmatpush3.bf16.msra.mxu0 %v4720_v8 }
 0x376   :  { %3700 = vmatprep.subr.bf16.mxu0 %v3699_v33 }
 0x378   :  { %3115 = vmatmul.mubr.f32.vlgmr.msra.gmra.mrb[2].mxu0 %v1618_v48 }
 0x379   :  { %3702 = vmatpush3.bf16.msra.mxu0 %v3699_v33  ;;  %3149 = vmatprep.mubr.f32.mxu0 %v4836_v34 }
 0x37a   :  { %3704 = vmatprep.subr.bf16.mxu0 %v3703_v59 }
 0x37d   :  { %3706 = vmatpush3.bf16.msra.mxu0 %v3703_v59 }
 0x37e   :  { %3708 = vmatprep.subr.bf16.mxu0 %v3707_v36 }
 0x381   :  { %3710 = vmatpush3.bf16.msra.mxu0 %v3707_v36 }
 0x382   :  { %3712 = vmatprep.subr.bf16.mxu0 %v3711_v14 }
 0x385   :  { %3714 = vmatpush3.bf16.msra.mxu0 %v3711_v14 }
 0x386   :  { %3716 = vmatprep.subr.bf16.mxu0 %v3715_v20 }
 0x389   :  { %3718 = vmatpush3.bf16.msra.mxu0 %v3715_v20 }
 0x38a   :  { %3720 = vmatprep.subr.bf16.mxu0 %v3719_v53 }
 0x38d   :  { %3722 = vmatpush3.bf16.msra.mxu0 %v3719_v53 }
 0x38e   :  { %3724 = vmatprep.subr.bf16.mxu0 %v3723_v11 }
 0x391   :  { %3726 = vmatpush3.bf16.msra.mxu0 %v3723_v11 }
 0x392   :  { %3728 = vmatprep.subr.bf16.mxu0 %v3727_v10 }
 0x395   :  { %3730 = vmatpush3.bf16.msra.mxu0 %v3727_v10 }
 0x396   :  { %3732 = vmatprep.subr.bf16.mxu0 %v4577_v56 }
 0x398   :  { %3150 = vmatmul.mubr.f32.vlgmr.msra.gmra.mrb[2].mxu0 %v4834_v25 }
 0x399   :  { %3734 = vmatpush3.bf16.msra.mxu0 %v4577_v56  ;;  %3184 = vmatprep.mubr.f32.mxu0 %v4836_v34 }
 0x39a   :  { %3736 = vmatprep.subr.bf16.mxu0 %v4585_v0 }
 0x39d   :  { %3738 = vmatpush3.bf16.msra.mxu0 %v4585_v0 }
 0x39e   :  { %3740 = vmatprep.subr.bf16.mxu0 %v4600_v51 }
 0x3a1   :  { %3742 = vmatpush3.bf16.msra.mxu0 %v4600_v51 }
 0x3a2   :  { %3744 = vmatprep.subr.bf16.mxu0 %v4610_v58 }
 0x3a5   :  { %3746 = vmatpush3.bf16.msra.mxu0 %v4610_v58  ;;  %v2232_v58 = vld [vmem:[%s5005_s6] ss:$0 sm:$0xff] }
 0x3a6   :  { %3748 = vmatprep.subr.bf16.mxu0 %v4696_v27 }
 0x3a9   :  { %3750 = vmatpush3.bf16.msra.mxu0 %v4696_v27 }
 0x3aa   :  { %3752 = vmatprep.subr.bf16.mxu0 %v4700_v42 }
 0x3ad   :  { %3754 = vmatpush3.bf16.msra.mxu0 %v4700_v42 }
 0x3ae   :  { %3756 = vmatprep.subr.bf16.mxu0 %v4704_v63 }
 0x3b1   :  { %3758 = vmatpush3.bf16.msra.mxu0 %v4704_v63 }
 0x3b2   :  { %3760 = vmatprep.subr.bf16.mxu0 %v4720_v8 }
 0x3b5   :  { %3762 = vmatpush3.bf16.msra.mxu0 %v4720_v8 }
 0x3b8   :  { %3185 = vmatmul.mubr.f32.vlgmr.msra.gmra.mrb[2].mxu0 %v4834_v25 }
 0x48b   :  { %v3186_v51 = vpop.f32.mrb[2].mxu0 }
 0x48c   :  { %v3769_v56 = vadd.f32 %v3186_v51, %v2232_v58  ;;  %v2199_v0 = vpop.f32.mrb[3].mxu0 }
 0x48d   :  { %v3770_v27 = vadd.f32 %v2232_v58, %v2199_v0 }
 0x48e   :  { %2210 = vst [vmem:[#allocation10 + $0x8] sm:$0xff] %v3769_v56 }
 0x48f   :  { %2209 = vst [vmem:[#allocation10] sm:$0xff] %v3770_v27 }
 0x490   :  { %3905 = shalt.err (!%p3902_p8)
}
 0x491   :  { %s3906_s6 = scalar_lea.hbm %s5006_s7, 256 }
 0x492   :  { %p3907_p9 = scmp.ne.s32.totalorder %s5006_s7, %s3906_s6  ;;  %p3910_p10 = scmp.lt.u32.totalorder %s3906_s6, %s5006_s7 }
 0x494   :  { %p3912_p11 = pnand %p3910_p10, %p3907_p9 }
 0x496   :  { %3915 = shalt.err (!%p3912_p11)
}
 0x497   :  { %2222 = dma.vmem_to_hbm [thread:$0]  %s2217_s8, 256, %s5006_s7, [#allocation4], %s3926_s13, %s3926_s13, %s3927_s14  }
 0x498   :  { %3922 = dma.done.wait [#allocation4], 256  }
 0x499   :  { %3923 = vsyncadd [#allocation4], 4294967040 }
 0x49a   :  { %2226 = vsyncpa [#allocation3], 1 }
 0x49b   :  { %2227 = vsyncpa [#allocation6], 1 }
 0x49c   :  { %2228 = vsyncpa [#allocation9], 1 }
 0x49d   :  { %2229 = vsyncpa [#allocation4], 1 }

// kernel: tpu_custom_call.1
= control target key start
LH: loop header
LB: loop body
LE: loop exit
PB: predicated region body
PF: predicated region fallthrough
CT: control target
= control target key end

     0   :  { %12 = vsyncpa [#allocation3], 0  ;;  %s4999_s0 = inlined_call_operand.hbm [shape: f32[16,128], index: 0, kind: input, shape index: {}]   ;;  %s5000_s1 = inlined_call_operand.hbm [shape: f32[128,128], index: 1, kind: input, shape index: {}]   ;;  %s5001_s2 = inlined_call_operand.vmem [shape: f32[1,128], index: 2, kind: input, shape index: {}]   ;;  %s5002_s3 = inlined_call_operand.hbm [shape: f32[128,128], index: 3, kind: input, shape index: {}]   ;;  %s5003_s4 = inlined_call_operand.vmem [shape: f32[1,128], index: 4, kind: input, shape index: {}]   ;;  %s5004_s5 = inlined_call_operand.hbm [shape: f32[128,128], index: 5, kind: input, shape index: {}]   ;;  %s5005_s6 = inlined_call_operand.vmem [shape: f32[1,128], index: 6, kind: input, shape index: {}]   ;;  %s5006_s7 = inlined_call_operand.hbm [shape: f32[16,128], index: 7, kind: output, shape index: {}]  }
   0x1   :  { %13 = vsyncpa [#allocation6], 0 }
   0x2   :  { %14 = vsyncpa [#allocation9], 0 }
   0x3   :  { %15 = vsyncpa [#allocation4], 0  ;;  %s3924_s24 = smov [#allocation5]   ;;  %s3925_s26 = smov [#allocation2]  }
   0x4   :  { %s33_s25 = sshll.u32 %s3924_s24, 4  ;;  %s21_s27 = sshll.u32 %s3925_s26, 4  ;;  %s34_s25 = int_to_ptr.vmem [resolvable:$true] %s33_s25  ;;  %s3971_s27 = int_to_ptr.vmem [resolvable:$true] %s21_s27 }
   0x5   :  { %s3806_s30 = scalar_lea.hbm %s5000_s1, 2048 }
   0x6   :  { %p3807_p0 = scmp.ne.s32.totalorder %s5000_s1, %s3806_s30  ;;  %p3810_p1 = scmp.lt.u32.totalorder %s3806_s30, %s5000_s1 }
   0x8   :  { %p3812_p2 = pnand %p3810_p1, %p3807_p0 }
   0xa   :  { %3815 = shalt.err (!%p3812_p2)
}
   0xb   :  { %s3816_s12 = scalar_lea.vmem %s34_s25, 2048  ;;  %p3821_p4 = scmp.lt.s32.totalorder %s34_s25, %s34_s25 }
   0xc   :  { %p3817_p3 = scmp.ne.s32.totalorder %s34_s25, %s3816_s12  ;;  %p3822_p5 = scmp.lt.s32.totalorder %s3816_s12, %s3816_s12 }
   0xe   :  { %p3823_p6 = por %p3822_p5, %p3821_p4 }
  0x10   :  { %p3824_p7 = pnand %p3823_p6, %p3817_p3 }
  0x12   :  { %3827 = shalt.err (!%p3824_p7)
}
  0x13   :  { %s3926_s13 = smov 128   ;;  %s3927_s14 = smov 8  }
  0x14   :  { %39 = dma.hbm_to_vmem [thread:$0]  %s5000_s1, 2048, %s34_s25, [#allocation6], %s3926_s13, %s3926_s13, %s3927_s14  }
  0x15   :  { %s3828_s19 = scalar_lea.hbm %s4999_s0, 256 }
  0x16   :  { %p3829_p8 = scmp.ne.s32.totalorder %s4999_s0, %s3828_s19  ;;  %p3832_p9 = scmp.lt.u32.totalorder %s3828_s19, %s4999_s0 }
  0x18   :  { %p3834_p10 = pnand %p3832_p9, %p3829_p8 }
  0x1a   :  { %3837 = shalt.err (!%p3834_p10)
}
  0x1b   :  { %s3838_s24 = scalar_lea.vmem %s3971_s27, 256  ;;  %p3843_p12 = scmp.lt.s32.totalorder %s3971_s27, %s3971_s27 }
  0x1c   :  { %p3839_p11 = scmp.ne.s32.totalorder %s3971_s27, %s3838_s24  ;;  %p3844_p13 = scmp.lt.s32.totalorder %s3838_s24, %s3838_s24 }
  0x1e   :  { %p3845_p0 = por %p3844_p13, %p3843_p12 }
  0x20   :  { %p3846_p1 = pnand %p3845_p0, %p3839_p11 }
  0x22   :  { %3849 = shalt.err (!%p3846_p1)
}
  0x23   :  { %27 = dma.hbm_to_vmem [thread:$0]  %s4999_s0, 256, %s3971_s27, [#allocation3], %s3926_s13, %s3926_s13, %s3927_s14  }
  0x24   :  { %s3928_s26 = smov [#allocation7]   ;;  %s3929_s29 = smov [#allocation8]  }
  0x25   :  { %s47_s28 = sshll.u32 %s3928_s26, 4  ;;  %s61_s30 = sshll.u32 %s3929_s29, 4  ;;  %s48_s28 = int_to_ptr.vmem [resolvable:$true] %s47_s28  ;;  %s4008_s30 = int_to_ptr.vmem [resolvable:$true] %s61_s30 }
  0x26   :  { %s3850_s10 = scalar_lea.hbm %s5002_s3, 2048 }
  0x27   :  { %p3851_p2 = scmp.ne.s32.totalorder %s5002_s3, %s3850_s10  ;;  %p3854_p3 = scmp.lt.u32.totalorder %s3850_s10, %s5002_s3 }
  0x29   :  { %p3856_p4 = pnand %p3854_p3, %p3851_p2 }
  0x2b   :  { %3859 = shalt.err (!%p3856_p4)
}
  0x2c   :  { %s3860_s0 = scalar_lea.vmem %s48_s28, 2048  ;;  %p3865_p6 = scmp.lt.s32.totalorder %s48_s28, %s48_s28 }
  0x2d   :  { %p3861_p5 = scmp.ne.s32.totalorder %s48_s28, %s3860_s0  ;;  %p3866_p7 = scmp.lt.s32.totalorder %s3860_s0, %s3860_s0 }
  0x2f   :  { %p3867_p8 = por %p3866_p7, %p3865_p6 }
  0x31   :  { %p3868_p9 = pnand %p3867_p8, %p3861_p5 }
  0x33   :  { %3871 = shalt.err (!%p3868_p9)
}
  0x34   :  { %53 = dma.hbm_to_vmem [thread:$0]  %s5002_s3, 2048, %s48_s28, [#allocation6], %s3926_s13, %s3926_s13, %s3927_s14  }
  0x35   :  { %s3872_s20 = scalar_lea.hbm %s5004_s5, 2048 }
  0x36   :  { %p3873_p10 = scmp.ne.s32.totalorder %s5004_s5, %s3872_s20  ;;  %p3876_p11 = scmp.lt.u32.totalorder %s3872_s20, %s5004_s5 }
  0x38   :  { %p3878_p12 = pnand %p3876_p11, %p3873_p10 }
  0x3a   :  { %3881 = shalt.err (!%p3878_p12)
}
  0x3b   :  { %s3882_s1 = scalar_lea.vmem %s4008_s30, 2048  ;;  %p3887_p0 = scmp.lt.s32.totalorder %s4008_s30, %s4008_s30 }
  0x3c   :  { %p3883_p13 = scmp.ne.s32.totalorder %s4008_s30, %s3882_s1  ;;  %p3888_p1 = scmp.lt.s32.totalorder %s3882_s1, %s3882_s1 }
  0x3e   :  { %p3889_p2 = por %p3888_p1, %p3887_p0 }
  0x40   :  { %p3890_p3 = pnand %p3889_p2, %p3883_p13 }
  0x42   :  { %3893 = shalt.err (!%p3890_p3)
}
  0x43   :  { %67 = dma.hbm_to_vmem [thread:$0]  %s5004_s5, 2048, %s4008_s30, [#allocation9], %s3926_s13, %s3926_s13, %s3927_s14  }
  0x44   :  { %3916 = dma.done.wait [#allocation3], 256  }
  0x45   :  { %3917 = vsyncadd [#allocation3], 4294967040 }
  0x46   :  { %3918 = dma.done.wait [#allocation6], 4096  }
  0x47   :  { %3919 = vsyncadd [#allocation6], 4294963200 }
  0x48   :  { %3920 = dma.done.wait [#allocation9], 2048  }
  0x49   :  { %3921 = vsyncadd [#allocation9], 4294965248  ;;  %v84_v0 = vld [vmem:[#allocation5] sm:$0xff]  ;;  %v85_v1 = vld [vmem:[#allocation5 + $0x8] sm:$0xff]  ;;  %s3930_s30 = smov [#allocation10]  }
  0x4a   :  { %v86_v2 = vld [vmem:[#allocation5 + $0x10] sm:$0xff]  ;;  %v108_v3 = vand.u32 4294901760, %v84_v0  ;;  %v111_v4 = vand.u32 4294901760, %v85_v1  ;;  %v4045_v5 = vld [vmem:[#allocation5 + $0x18] sm:$0xff]  ;;  %v4047_v7 = vld [vmem:[#allocation5 + $0x20] sm:$0xff]  ;;  %s2216_s8 = sshll.u32 %s3930_s30, 4  ;;  %s2217_s8 = int_to_ptr.vmem [resolvable:$true] %s2216_s8 }
  0x4b   :  { %v114_v6 = vand.u32 4294901760, %v86_v2  ;;  %v4049_v8 = vld [vmem:[#allocation5 + $0x28] sm:$0xff]  ;;  %v117_v9 = vand.u32 4294901760, %v4045_v5  ;;  %v120_v11 = vand.u32 4294901760, %v4047_v7  ;;  %v4058_v14 = vld [vmem:[#allocation5 + $0x30] sm:$0xff]  ;;  %v4060_v15 = vld [vmem:[#allocation5 + $0x38] sm:$0xff]  ;;  %p3899_p5 = scmp.lt.s32.totalorder %s2217_s8, %s2217_s8 }
  0x4c   :  { %v4052_v10 = vpack.c.bf16 %v111_v4, %v108_v3  ;;  %v123_v12 = vand.u32 4294901760, %v4049_v8  ;;  %v82_v16 = vld [vmem:[#allocation2] sm:$0xff]  ;;  %v126_v19 = vand.u32 4294901760, %v4058_v14  ;;  %v129_v20 = vand.u32 4294901760, %v4060_v15  ;;  %v4078_v21 = vld [vmem:[#allocation5 + $0x40] sm:$0xff]  ;;  %v4080_v22 = vld [vmem:[#allocation5 + $0x48] sm:$0xff] }
  0x4d   :  { %v4056_v13 = vpack.c.bf16 %v117_v9, %v114_v6  ;;  %v4066_v17 = vand.u32 4294901760, %v82_v16  ;;  %v132_v26 = vand.u32 4294901760, %v4078_v21  ;;  %v135_v27 = vand.u32 4294901760, %v4080_v22  ;;  %v4098_v28 = vld [vmem:[#allocation5 + $0x50] sm:$0xff]  ;;  %v4100_v29 = vld [vmem:[#allocation5 + $0x58] sm:$0xff]  ;;  %v4115_v36 = vld [vmem:[#allocation5 + $0x60] sm:$0xff] }
  0x4e   :  { %3188 = vmatprep.subr.bf16.mxu1 %v4052_v10  ;;  %3284 = vmatprep.subr.bf16.mxu0 %v4052_v10  ;;  %v4074_v18 = vpack.c.bf16 %v123_v12, %v120_v11  ;;  %v4094_v25 = vpack.c.bf16 %v129_v20, %v126_v19  ;;  %v138_v31 = vand.u32 4294901760, %v4098_v28  ;;  %v83_v33 = vld [vmem:[#allocation2 + $0x8] sm:$0xff]  ;;  %v141_v35 = vand.u32 4294901760, %v4100_v29  ;;  %v4117_v37 = vld [vmem:[#allocation5 + $0x68] sm:$0xff]  ;;  %v4129_v43 = vld [vmem:[#allocation5 + $0x70] sm:$0xff]  ;;  %s3894_s9 = scalar_lea.vmem %s2217_s8, 256 }
  0x4f   :  { %3190 = vmatpush3.bf16.msra.mxu1 %v4052_v10  ;;  %3286 = vmatpush3.bf16.msra.mxu0 %v4052_v10  ;;  %v4083_v23 = vsub.f32 %v82_v16, %v4066_v17  ;;  %v4112_v34 = vpack.c.bf16 %v135_v27, %v132_v26  ;;  %v4119_v38 = vsub.f32 %v84_v0, %v108_v3  ;;  %v4123_v40 = vand.u32 4294901760, %v83_v33  ;;  %v4131_v44 = vld [vmem:[#allocation5 + $0x78] sm:$0xff]  ;;  %p3895_p4 = scmp.ne.s32.totalorder %s2217_s8, %s3894_s9  ;;  %p3900_p6 = scmp.lt.s32.totalorder %s3894_s9, %s3894_s9 }
  0x50   :  { %3192 = vmatprep.subr.bf16.mxu1 %v4056_v13  ;;  %3288 = vmatprep.subr.bf16.mxu0 %v4056_v13  ;;  %v4121_v39 = vsub.f32 %v85_v1, %v111_v4  ;;  %v144_v41 = vand.u32 4294901760, %v4115_v36  ;;  %v147_v42 = vand.u32 4294901760, %v4117_v37  ;;  %v4133_v45 = vsub.f32 %v86_v2, %v114_v6 }
  0x51   :  { %v190_v24 = vand.u32 4294901760, %v4083_v23  ;;  %v4141_v46 = vpack.c.bf16 %v141_v35, %v138_v31  ;;  %v211_v47 = vand.u32 4294901760, %v4119_v38  ;;  %v4146_v49 = vsub.f32 %v4045_v5, %v117_v9  ;;  %p3901_p7 = por %p3900_p6, %p3899_p5 }
  0x52   :  { %v218_v48 = vand.u32 4294901760, %v4121_v39  ;;  %v150_v50 = vand.u32 4294901760, %v4129_v43  ;;  %v153_v51 = vand.u32 4294901760, %v4131_v44  ;;  %v4151_v52 = vsub.f32 %v83_v33, %v4123_v40 }
  0x53   :  { %3194 = vmatpush3.bf16.msra.mxu1 %v4056_v13  ;;  %3290 = vmatpush3.bf16.msra.mxu0 %v4056_v13  ;;  %v191_v30 = vsub.f32 %v4083_v23, %v190_v24  ;;  %v4159_v53 = vpack.c.bf16 %v147_v42, %v144_v41  ;;  %v225_v54 = vand.u32 4294901760, %v4133_v45  ;;  %v4165_v55 = vsub.f32 %v4047_v7, %v120_v11  ;;  %p3902_p8 = pnand %p3901_p7, %p3895_p4 }
  0x54   :  { %3196 = vmatprep.subr.bf16.mxu1 %v4074_v18  ;;  %3292 = vmatprep.subr.bf16.mxu0 %v4074_v18  ;;  %v212_v56 = vsub.f32 %v4119_v38, %v211_v47  ;;  %v219_v57 = vsub.f32 %v4121_v39, %v218_v48  ;;  %v232_v58 = vand.u32 4294901760, %v4146_v49  ;;  %v4175_v59 = vsub.f32 %v4049_v8, %v123_v12 }
  0x55   :  { %2694 = vmatprep.mubr.f32.mxu0 %v190_v24  ;;  %v192_v32 = vand.u32 4294901760, %v191_v30  ;;  %v4181_v60 = vpack.c.bf16 %v153_v51, %v150_v50  ;;  %v200_v61 = vand.u32 4294901760, %v4151_v52  ;;  %v226_v62 = vsub.f32 %v4133_v45, %v225_v54 }
  0x56   :  { %v239_v63 = vand.u32 4294901760, %v4165_v55  ;;  %v4191_v0 = vsub.f32 %v4058_v14, %v126_v19  ;;  %v4196_v1 = vsub.f32 %v4060_v15, %v129_v20  ;;  %v213_v2 = vand.u32 4294901760, %v212_v56 }
  0x57   :  { %3198 = vmatpush3.bf16.msra.mxu1 %v4074_v18  ;;  %3294 = vmatpush3.bf16.msra.mxu0 %v4074_v18  ;;  %v220_v3 = vand.u32 4294901760, %v219_v57  ;;  %v233_v4 = vsub.f32 %v4146_v49, %v232_v58  ;;  %v246_v5 = vand.u32 4294901760, %v4175_v59  ;;  %v3315_v6 = vpack.c.bf16 %v218_v48, %v211_v47 }
  0x58   :  { %3200 = vmatprep.subr.bf16.mxu1 %v4094_v25  ;;  %3296 = vmatprep.subr.bf16.mxu0 %v4094_v25  ;;  %v201_v7 = vsub.f32 %v4151_v52, %v200_v61  ;;  %v4206_v8 = vsub.f32 %v4078_v21, %v132_v26  ;;  %v227_v9 = vand.u32 4294901760, %v226_v62  ;;  %v240_v11 = vsub.f32 %v4165_v55, %v239_v63 }
  0x59   :  { %2589 = vmatprep.mubr.f32.mxu1 %v192_v32  ;;  %v253_v12 = vand.u32 4294901760, %v4191_v0  ;;  %v260_v14 = vand.u32 4294901760, %v4196_v1  ;;  %v3219_v15 = vpack.c.bf16 %v220_v3, %v213_v2  ;;  %v234_v16 = vand.u32 4294901760, %v233_v4 }
  0x5a   :  { %v247_v19 = vsub.f32 %v4175_v59, %v246_v5  ;;  %v4219_v20 = vsub.f32 %v4080_v22, %v135_v27  ;;  %v202_v21 = vand.u32 4294901760, %v201_v7  ;;  %v3319_v24 = vpack.c.bf16 %v232_v58, %v225_v54 }
  0x5b   :  { %3202 = vmatpush3.bf16.msra.mxu1 %v4094_v25  ;;  %3298 = vmatpush3.bf16.msra.mxu0 %v4094_v25  ;;  %v267_v26 = vand.u32 4294901760, %v4206_v8  ;;  %v4225_v30 = vsub.f32 %v4098_v28, %v138_v31  ;;  %v254_v32 = vsub.f32 %v4191_v0, %v253_v12  ;;  %v261_v33 = vsub.f32 %v4196_v1, %v260_v14 }
  0x5c   :  { %3204 = vmatprep.subr.bf16.mxu1 %v4112_v34  ;;  %3300 = vmatprep.subr.bf16.mxu0 %v4112_v34  ;;  %v4234_v22 = vsub.f32 %v4100_v29, %v141_v35  ;;  %v3223_v27 = vpack.c.bf16 %v234_v16, %v227_v9  ;;  %v241_v47 = vand.u32 4294901760, %v240_v11  ;;  %v248_v48 = vand.u32 4294901760, %v247_v19 }
  0x5d   :  { %v274_v28 = vand.u32 4294901760, %v4219_v20  ;;  %v3323_v31 = vpack.c.bf16 %v246_v5, %v239_v63  ;;  %v268_v54 = vsub.f32 %v4206_v8, %v267_v26  ;;  %v4241_v56 = vsub.f32 %v4115_v36, %v144_v41 }
  0x5e   :  { %v255_v29 = vand.u32 4294901760, %v254_v32  ;;  %v262_v35 = vand.u32 4294901760, %v261_v33  ;;  %v281_v57 = vand.u32 4294901760, %v4225_v30  ;;  %v288_v58 = vand.u32 4294901760, %v4234_v22 }
  0x5f   :  { %3206 = vmatpush3.bf16.msra.mxu1 %v4112_v34  ;;  %3302 = vmatpush3.bf16.msra.mxu0 %v4112_v34  ;;  %v3227_v62 = vpack.c.bf16 %v248_v48, %v241_v47  ;;  %v4249_v63 = vsub.f32 %v4117_v37, %v147_v42  ;;  %v3327_v36 = vpack.c.bf16 %v260_v14, %v253_v12  ;;  %v269_v41 = vand.u32 4294901760, %v268_v54 }
  0x60   :  { %3208 = vmatprep.subr.bf16.mxu1 %v4141_v46  ;;  %3304 = vmatprep.subr.bf16.mxu0 %v4141_v46  ;;  %v3231_v2 = vpack.c.bf16 %v262_v35, %v255_v29  ;;  %v282_v3 = vsub.f32 %v4225_v30, %v281_v57  ;;  %v289_v4 = vsub.f32 %v4234_v22, %v288_v58  ;;  %v295_v5 = vand.u32 4294901760, %v4241_v56 }
  0x61   :  { %v302_v37 = vand.u32 4294901760, %v4249_v63  ;;  %v4260_v42 = vsub.f32 %v4129_v43, %v150_v50  ;;  %v4265_v7 = vsub.f32 %v4131_v44, %v153_v51  ;;  %v3331_v9 = vpack.c.bf16 %v274_v28, %v267_v26 }
  0x62   :  { %v283_v11 = vand.u32 4294901760, %v282_v3  ;;  %v290_v12 = vand.u32 4294901760, %v289_v4  ;;  %v296_v14 = vsub.f32 %v4241_v56, %v295_v5  ;;  %v3335_v51 = vpack.c.bf16 %v288_v58, %v281_v57  ;;  %v802_v57 = vld [vmem:[#allocation7 + $0x48] sm:$0xff]  ;;  %v805_v4 = vld [vmem:[#allocation7 + $0x60] sm:$0xff] }
  0x63   :  { %3210 = vmatpush3.bf16.msra.mxu1 %v4141_v46  ;;  %3306 = vmatpush3.bf16.msra.mxu0 %v4141_v46  ;;  %v303_v16 = vsub.f32 %v4249_v63, %v302_v37  ;;  %v309_v43 = vand.u32 4294901760, %v4260_v42  ;;  %v316_v50 = vand.u32 4294901760, %v4265_v7  ;;  %v3339_v33 = vpack.c.bf16 %v302_v37, %v295_v5  ;;  %v806_v5 = vld [vmem:[#allocation7 + $0x68] sm:$0xff] }
  0x64   :  { %3212 = vmatprep.subr.bf16.mxu1 %v4159_v53  ;;  %3308 = vmatprep.subr.bf16.mxu0 %v4159_v53  ;;  %v3239_v44 = vpack.c.bf16 %v290_v12, %v283_v11  ;;  %v297_v19 = vand.u32 4294901760, %v296_v14  ;;  %v3255_v54 = vpack.c.bf16 %v4146_v49, %v4133_v45  ;;  %v856_v37 = vand.u32 4294901760, %v806_v5  ;;  %v807_v11 = vld [vmem:[#allocation7 + $0x70] sm:$0xff]  ;;  %v808_v12 = vld [vmem:[#allocation7 + $0x78] sm:$0xff] }
  0x65   :  { %v317_v26 = vsub.f32 %v4265_v7, %v316_v50  ;;  %v859_v14 = vand.u32 4294901760, %v807_v11 }
  0x67   :  { %3214 = vmatpush3.bf16.msra.mxu1 %v4159_v53  ;;  %3310 = vmatpush3.bf16.msra.mxu0 %v4159_v53  ;;  %v318_v47 = vand.u32 4294901760, %v317_v26 }
  0x68   :  { %3216 = vmatprep.subr.bf16.mxu1 %v4181_v60  ;;  %3312 = vmatprep.subr.bf16.mxu0 %v4181_v60 }
  0x6b   :  { %3218 = vmatpush3.bf16.msra.mxu1 %v4181_v60  ;;  %3314 = vmatpush3.bf16.msra.mxu0 %v4181_v60 }
  0x6c   :  { %3220 = vmatprep.subr.bf16.mxu1 %v3219_v15  ;;  %3316 = vmatprep.subr.bf16.mxu0 %v3315_v6 }
  0x6e   :  { %2590 = vmatmul.mubr.f32.vlgmr.msra.gmra.mrb[0].mxu1 %v202_v21  ;;  %2695 = vmatmul.mubr.f32.vlgmr.msra.gmra.mrb[0].mxu0 %v200_v61  ;;  %v275_v61 = vsub.f32 %v4219_v20, %v274_v28  ;;  %v304_v21 = vand.u32 4294901760, %v303_v16  ;;  %v3343_v28 = vpack.c.bf16 %v316_v50, %v309_v43 }
  0x6f   :  { %3222 = vmatpush3.bf16.msra.mxu1 %v3219_v15  ;;  %3318 = vmatpush3.bf16.msra.mxu0 %v3315_v6 }
  0x70   :  { %3224 = vmatprep.subr.bf16.mxu1 %v3223_v27  ;;  %3320 = vmatprep.subr.bf16.mxu0 %v3319_v24  ;;  %v276_v6 = vand.u32 4294901760, %v275_v61  ;;  %v3243_v32 = vpack.c.bf16 %v304_v21, %v297_v19 }
  0x71   :  { %2624 = vmatprep.mubr.f32.mxu1 %v4066_v17  ;;  %2729 = vmatprep.mubr.f32.mxu0 %v4066_v17 }
  0x72   :  { %v3235_v15 = vpack.c.bf16 %v276_v6, %v269_v41  ;;  %v853_v6 = vand.u32 4294901760, %v805_v4 }
  0x73   :  { %3226 = vmatpush3.bf16.msra.mxu1 %v3223_v27  ;;  %3322 = vmatpush3.bf16.msra.mxu0 %v3319_v24  ;;  %v310_v24 = vsub.f32 %v4260_v42, %v309_v43 }
  0x74   :  { %3228 = vmatprep.subr.bf16.mxu1 %v3227_v62  ;;  %3324 = vmatprep.subr.bf16.mxu0 %v3323_v31 }
  0x75   :  { %v311_v27 = vand.u32 4294901760, %v310_v24 }
  0x77   :  { %3230 = vmatpush3.bf16.msra.mxu1 %v3227_v62  ;;  %3326 = vmatpush3.bf16.msra.mxu0 %v3323_v31  ;;  %v3247_v48 = vpack.c.bf16 %v318_v47, %v311_v27  ;;  %v3251_v31 = vpack.c.bf16 %v4121_v39, %v4119_v38  ;;  %v3259_v38 = vpack.c.bf16 %v4175_v59, %v4165_v55  ;;  %v4308_v55 = vld [vmem:[#allocation7 + $0x18] sm:$0xff]  ;;  %v844_v62 = vand.u32 4294901760, %v802_v57 }
  0x78   :  { %3232 = vmatprep.subr.bf16.mxu1 %v3231_v2  ;;  %3328 = vmatprep.subr.bf16.mxu0 %v3327_v36  ;;  %v3263_v39 = vpack.c.bf16 %v4196_v1, %v4191_v0  ;;  %v826_v0 = vand.u32 4294901760, %v4308_v55  ;;  %v4316_v1 = vld [vmem:[#allocation7 + $0x20] sm:$0xff] }
  0x7b   :  { %3234 = vmatpush3.bf16.msra.mxu1 %v3231_v2  ;;  %3330 = vmatpush3.bf16.msra.mxu0 %v3327_v36  ;;  %v804_v36 = vld [vmem:[#allocation7 + $0x58] sm:$0xff] }
  0x7c   :  { %3236 = vmatprep.subr.bf16.mxu1 %v3235_v15  ;;  %3332 = vmatprep.subr.bf16.mxu0 %v3331_v9  ;;  %v850_v2 = vand.u32 4294901760, %v804_v36 }
  0x7f   :  { %3238 = vmatpush3.bf16.msra.mxu1 %v3235_v15  ;;  %3334 = vmatpush3.bf16.msra.mxu0 %v3331_v9  ;;  %v862_v15 = vand.u32 4294901760, %v808_v12 }
  0x80   :  { %3240 = vmatprep.subr.bf16.mxu1 %v3239_v44  ;;  %3336 = vmatprep.subr.bf16.mxu0 %v3335_v51 }
  0x81   :  { %v4375_v50 = vpack.c.bf16 %v862_v15, %v859_v14 }
  0x83   :  { %3242 = vmatpush3.bf16.msra.mxu1 %v3239_v44  ;;  %3338 = vmatpush3.bf16.msra.mxu0 %v3335_v51 }
  0x84   :  { %3244 = vmatprep.subr.bf16.mxu1 %v3243_v32  ;;  %3340 = vmatprep.subr.bf16.mxu0 %v3339_v33 }
  0x87   :  { %3246 = vmatpush3.bf16.msra.mxu1 %v3243_v32  ;;  %3342 = vmatpush3.bf16.msra.mxu0 %v3339_v33  ;;  %v4390_v32 = vsub.f32 %v802_v57, %v844_v62 }
  0x88   :  { %3248 = vmatprep.subr.bf16.mxu1 %v3247_v48  ;;  %3344 = vmatprep.subr.bf16.mxu0 %v3343_v28 }
  0x89   :  { %v983_v27 = vand.u32 4294901760, %v4390_v32 }
  0x8b   :  { %3250 = vmatpush3.bf16.msra.mxu1 %v3247_v48  ;;  %3346 = vmatpush3.bf16.msra.mxu0 %v3343_v28  ;;  %v984_v48 = vsub.f32 %v4390_v32, %v983_v27 }
  0x8c   :  { %3252 = vmatprep.subr.bf16.mxu1 %v3251_v31  ;;  %3348 = vmatprep.subr.bf16.mxu0 %v4052_v10 }
  0x8e   :  { %2625 = vmatmul.mubr.f32.vlgmr.msra.gmra.mrb[0].mxu1 %v4123_v40  ;;  %2730 = vmatmul.mubr.f32.vlgmr.msra.gmra.mrb[0].mxu0 %v4123_v40 }
  0x8f   :  { %3254 = vmatpush3.bf16.msra.mxu1 %v3251_v31  ;;  %3350 = vmatpush3.bf16.msra.mxu0 %v4052_v10  ;;  %v3267_v10 = vpack.c.bf16 %v4219_v20, %v4206_v8  ;;  %v4318_v8 = vld [vmem:[#allocation7 + $0x28] sm:$0xff]  ;;  %v829_v20 = vand.u32 4294901760, %v4316_v1  ;;  %v4402_v31 = vsub.f32 %v804_v36, %v850_v2  ;;  %v4427_v36 = vsub.f32 %v808_v12, %v862_v15 }
  0x90   :  { %3256 = vmatprep.subr.bf16.mxu1 %v3255_v54  ;;  %3352 = vmatprep.subr.bf16.mxu0 %v4056_v13 }
  0x91   :  { %2659 = vmatprep.mubr.f32.mxu1 %v4083_v23  ;;  %2764 = vmatprep.mubr.f32.mxu0 %v4066_v17  ;;  %v3275_v17 = vpack.c.bf16 %v4249_v63, %v4241_v56  ;;  %v794_v23 = vld [vmem:[#allocation7 + $0x8] sm:$0xff]  ;;  %v4332_v56 = vld [vmem:[#allocation7 + $0x38] sm:$0xff]  ;;  %v803_v63 = vld [vmem:[#allocation7 + $0x50] sm:$0xff] }
  0x92   :  { %v820_v49 = vand.u32 4294901760, %v794_v23  ;;  %v838_v35 = vand.u32 4294901760, %v4332_v56  ;;  %v847_v41 = vand.u32 4294901760, %v803_v63 }
  0x93   :  { %3258 = vmatpush3.bf16.msra.mxu1 %v3255_v54  ;;  %3354 = vmatpush3.bf16.msra.mxu0 %v4056_v13  ;;  %v3271_v13 = vpack.c.bf16 %v4234_v22, %v4225_v30  ;;  %v832_v30 = vand.u32 4294901760, %v4318_v8  ;;  %v4330_v22 = vld [vmem:[#allocation7 + $0x30] sm:$0xff] }
  0x94   :  { %3260 = vmatprep.subr.bf16.mxu1 %v3259_v38  ;;  %3356 = vmatprep.subr.bf16.mxu0 %v4074_v18  ;;  %v835_v29 = vand.u32 4294901760, %v4330_v22  ;;  %v4361_v3 = vpack.c.bf16 %v850_v2, %v847_v41  ;;  %v4369_v9 = vsub.f32 %v794_v23, %v820_v49  ;;  %v4400_v28 = vsub.f32 %v803_v63, %v847_v41 }
  0x95   :  { %v4414_v23 = vsub.f32 %v805_v4, %v853_v6  ;;  %v4425_v63 = vsub.f32 %v807_v11, %v859_v14 }
  0x96   :  { %v927_v43 = vand.u32 4294901760, %v4369_v9 }
  0x97   :  { %3262 = vmatpush3.bf16.msra.mxu1 %v3259_v38  ;;  %3358 = vmatpush3.bf16.msra.mxu0 %v4074_v18  ;;  %v793_v18 = vld [vmem:[#allocation7] sm:$0xff]  ;;  %v985_v38 = vand.u32 4294901760, %v984_v48  ;;  %v5008_v4 = vand.u32 4294901760, %v4425_v63  ;;  %v4462_v48 = vpack.c.bf16 %v4427_v36, %v4425_v63 }
  0x98   :  { %3264 = vmatprep.subr.bf16.mxu1 %v3263_v39  ;;  %3360 = vmatprep.subr.bf16.mxu0 %v4094_v25  ;;  %v817_v45 = vand.u32 4294901760, %v793_v18  ;;  %v928_v51 = vsub.f32 %v4369_v9, %v927_v43 }
  0x9a   :  { %v4312_v59 = vpack.c.bf16 %v820_v49, %v817_v45  ;;  %v929_v21 = vand.u32 4294901760, %v928_v51 }
  0x9b   :  { %3266 = vmatpush3.bf16.msra.mxu1 %v3263_v39  ;;  %3362 = vmatpush3.bf16.msra.mxu0 %v4094_v25  ;;  %v3279_v25 = vpack.c.bf16 %v4265_v7, %v4260_v42  ;;  %v4365_v42 = vpack.c.bf16 %v856_v37, %v853_v6  ;;  %v4367_v7 = vsub.f32 %v793_v18, %v817_v45  ;;  %v990_v39 = vand.u32 4294901760, %v4400_v28 }
  0x9c   :  { %3268 = vmatprep.subr.bf16.mxu1 %v3267_v10  ;;  %3364 = vmatprep.subr.bf16.mxu0 %v4112_v34 }
  0x9d   :  { %v920_v16 = vand.u32 4294901760, %v4367_v7  ;;  %v4446_v51 = vpack.c.bf16 %v4369_v9, %v4367_v7 }
  0x9f   :  { %3270 = vmatpush3.bf16.msra.mxu1 %v3267_v10  ;;  %3366 = vmatpush3.bf16.msra.mxu0 %v4112_v34  ;;  %v4306_v34 = vld [vmem:[#allocation7 + $0x10] sm:$0xff]  ;;  %v921_v44 = vsub.f32 %v4367_v7, %v920_v16  ;;  %v5011_v10 = vand.u32 4294901760, %v4402_v31 }
  0xa0   :  { %3272 = vmatprep.subr.bf16.mxu1 %v3271_v13  ;;  %3368 = vmatprep.subr.bf16.mxu0 %v4141_v46 }
  0xa1   :  { %v922_v19 = vand.u32 4294901760, %v921_v44  ;;  %v998_v18 = vsub.f32 %v4402_v31, %v5011_v10 }
  0xa3   :  { %3274 = vmatpush3.bf16.msra.mxu1 %v3271_v13  ;;  %3370 = vmatpush3.bf16.msra.mxu0 %v4141_v46  ;;  %v823_v46 = vand.u32 4294901760, %v4306_v34  ;;  %v4385_v24 = vpack.c.bf16 %v929_v21, %v922_v19  ;;  %v999_v49 = vand.u32 4294901760, %v998_v18  ;;  %v4454_v21 = vpack.c.bf16 %v4402_v31, %v4400_v28 }
  0xa4   :  { %3276 = vmatprep.subr.bf16.mxu1 %v3275_v17  ;;  %3372 = vmatprep.subr.bf16.mxu0 %v4159_v53 }
  0xa5   :  { %v4470_v18 = vsub.f32 %v4306_v34, %v823_v46  ;;  %v4482_v34 = vsub.f32 %v4316_v1, %v829_v20 }
  0xa7   :  { %3278 = vmatpush3.bf16.msra.mxu1 %v3275_v17  ;;  %3374 = vmatpush3.bf16.msra.mxu0 %v4159_v53  ;;  %v4326_v53 = vpack.c.bf16 %v826_v0, %v823_v46  ;;  %v991_v17 = vsub.f32 %v4400_v28, %v990_v39  ;;  %v1513_v28 = vld [vmem:[#allocation8 + $0x58] sm:$0xff] }
  0xa8   :  { %3280 = vmatprep.subr.bf16.mxu1 %v3279_v25  ;;  %3376 = vmatprep.subr.bf16.mxu0 %v4181_v60 }
  0xa9   :  { %v992_v45 = vand.u32 4294901760, %v991_v17 }
  0xab   :  { %3282 = vmatpush3.bf16.msra.mxu1 %v3279_v25  ;;  %3378 = vmatpush3.bf16.msra.mxu0 %v4181_v60  ;;  %v4342_v60 = vpack.c.bf16 %v832_v30, %v829_v20  ;;  %v4416_v25 = vsub.f32 %v806_v5, %v856_v37  ;;  %v5007_v5 = vand.u32 4294901760, %v4427_v36  ;;  %v1019_v37 = vsub.f32 %v4425_v63, %v5008_v4 }
  0xac   :  { %3380 = vmatprep.subr.bf16.mxu1 %v4312_v59  ;;  %v948_v20 = vand.u32 4294901760, %v4482_v34 }
  0xad   :  { %v5009_v57 = vand.u32 4294901760, %v4416_v25  ;;  %v1026_v11 = vsub.f32 %v4427_v36, %v5007_v5  ;;  %v1020_v14 = vand.u32 4294901760, %v1019_v37 }
  0xae   :  { %2660 = vmatmul.mubr.f32.vlgmr.msra.gmra.mrb[0].mxu1 %v4151_v52  ;;  %2765 = vmatmul.mubr.f32.vlgmr.msra.gmra.mrb[0].mxu0 %v4123_v40  ;;  %v4352_v40 = vpack.c.bf16 %v838_v35, %v835_v29  ;;  %v801_v52 = vld [vmem:[#allocation7 + $0x40] sm:$0xff] }
  0xaf   :  { %3382 = vmatpush3.bf16.msra.mxu1 %v4312_v59  ;;  %v841_v58 = vand.u32 4294901760, %v801_v52  ;;  %v1012_v41 = vsub.f32 %v4416_v25, %v5009_v57  ;;  %v1027_v15 = vand.u32 4294901760, %v1026_v11  ;;  %v934_v11 = vand.u32 4294901760, %v4470_v18 }
  0xb0   :  { %3384 = vmatprep.subr.bf16.mxu1 %v4326_v53 }
  0xb1   :  { %v4357_v61 = vpack.c.bf16 %v844_v62, %v841_v58  ;;  %v4388_v26 = vsub.f32 %v801_v52, %v841_v58  ;;  %v5010_v52 = vand.u32 4294901760, %v4414_v23  ;;  %v4420_v58 = vpack.c.bf16 %v999_v49, %v992_v45 }
  0xb2   :  { %v1013_v6 = vand.u32 4294901760, %v1012_v41  ;;  %v4442_v44 = vpack.c.bf16 %v1027_v15, %v1020_v14  ;;  %v4475_v45 = vsub.f32 %v4308_v55, %v826_v0  ;;  %v4487_v55 = vsub.f32 %v4318_v8, %v832_v30 }
  0xb3   :  { %3386 = vmatpush3.bf16.msra.mxu1 %v4326_v53  ;;  %v976_v33 = vand.u32 4294901760, %v4388_v26  ;;  %v1005_v62 = vsub.f32 %v4414_v23, %v5010_v52  ;;  %v4450_v19 = vpack.c.bf16 %v4390_v32, %v4388_v26  ;;  %v4507_v30 = vsub.f32 %v4330_v22, %v835_v29 }
  0xb4   :  { %3388 = vmatprep.subr.bf16.mxu1 %v4342_v60  ;;  %v941_v14 = vand.u32 4294901760, %v4475_v45  ;;  %v955_v8 = vand.u32 4294901760, %v4487_v55  ;;  %v5024_v32 = vand.u32 4294901760, %v4427_v36 }
  0xb5   :  { %v977_v47 = vsub.f32 %v4388_v26, %v976_v33  ;;  %v1006_v2 = vand.u32 4294901760, %v1005_v62  ;;  %v962_v29 = vand.u32 4294901760, %v4507_v30  ;;  %v5023_v26 = vand.u32 4294901760, %v4425_v63 }
  0xb6   :  { %v942_v1 = vsub.f32 %v4475_v45, %v941_v14  ;;  %v3515_v7 = vpack.c.bf16 %v955_v8, %v948_v20 }
  0xb7   :  { %3390 = vmatpush3.bf16.msra.mxu1 %v4342_v60  ;;  %v978_v54 = vand.u32 4294901760, %v977_v47  ;;  %v4440_v12 = vpack.c.bf16 %v1013_v6, %v1006_v2  ;;  %v4458_v47 = vpack.c.bf16 %v4416_v25, %v4414_v23  ;;  %v963_v52 = vsub.f32 %v4507_v30, %v962_v29 }
  0xb8   :  { %3392 = vmatprep.subr.bf16.mxu1 %v4352_v40 }
  0xb9   :  { %v4406_v13 = vpack.c.bf16 %v985_v38, %v978_v54  ;;  %v2230_v54 = vld [vmem:[%s5001_s2] ss:$0 sm:$0xff] }
  0xbb   :  { %3394 = vmatpush3.bf16.msra.mxu1 %v4352_v40 }
  0xbc   :  { %3396 = vmatprep.subr.bf16.mxu1 %v4357_v61 }
  0xbf   :  { %3398 = vmatpush3.bf16.msra.mxu1 %v4357_v61 }
  0xc0   :  { %3400 = vmatprep.subr.bf16.mxu1 %v4361_v3 }
  0xc3   :  { %3402 = vmatpush3.bf16.msra.mxu1 %v4361_v3 }
  0xc4   :  { %3404 = vmatprep.subr.bf16.mxu1 %v4365_v42 }
  0xc7   :  { %3406 = vmatpush3.bf16.msra.mxu1 %v4365_v42 }
  0xc8   :  { %3408 = vmatprep.subr.bf16.mxu1 %v4375_v50 }
  0xcb   :  { %3410 = vmatpush3.bf16.msra.mxu1 %v4375_v50 }
  0xcc   :  { %3412 = vmatprep.subr.bf16.mxu1 %v4385_v24 }
 0x181   :  { %v2661_v38 = vpop.f32.mrb[0].mxu1  ;;  %v2766_v17 = vpop.f32.mrb[0].mxu0 }
 0x182   :  { %v3763_v49 = vadd.f32 %v2661_v38, %v2230_v54  ;;  %v465_v62 = vpop.f32.mrb[1].mxu1  ;;  %v781_v41 = vpop.f32.mrb[1].mxu0  ;;  %v935_v38 = vsub.f32 %v4470_v18, %v934_v11 }
 0x183   :  { %v3765_v2 = vadd.f32 %v2230_v54, %v465_v62 }
 0x184   :  { %v3764_v6 = vadd.f32 %v3763_v49, %v2766_v17  ;;  %v4512_v49 = vsub.f32 %v4332_v56, %v838_v35  ;;  %v956_v56 = vsub.f32 %v4487_v55, %v955_v8 }
 0x185   :  { %v3766_v37 = vadd.f32 %v3765_v2, %v781_v41 }
 0x186   :  { %v792_v46 = vmax.f32 %v3764_v6, 0.0  ;;  %v936_v6 = vand.u32 4294901760, %v935_v38  ;;  %v969_v35 = vand.u32 4294901760, %v4512_v49  ;;  %v957_v57 = vand.u32 4294901760, %v956_v56 }
 0x187   :  { %v791_v0 = vmax.f32 %v3766_v37, 0.0  ;;  %v943_v37 = vand.u32 4294901760, %v942_v1 }
 0x188   :  { %v4489_v15 = vand.u32 4294901760, %v792_v46  ;;  %v970_v10 = vsub.f32 %v4512_v49, %v969_v35  ;;  %v3519_v9 = vpack.c.bf16 %v969_v35, %v962_v29 }
 0x189   :  { %v4491_v54 = vand.u32 4294901760, %v791_v0  ;;  %v3415_v1 = vpack.c.bf16 %v943_v37, %v936_v6  ;;  %v964_v6 = vand.u32 4294901760, %v963_v52  ;;  %v4557_v52 = vld [vmem:[#allocation8 + $0x10] sm:$0xff] }
 0x18a   :  { %v4501_v17 = vsub.f32 %v792_v46, %v4489_v15  ;;  %v949_v46 = vsub.f32 %v4482_v34, %v948_v20  ;;  %v971_v37 = vand.u32 4294901760, %v970_v10  ;;  %v4553_v10 = vld [vmem:[#allocation8] sm:$0xff] }
 0x18b   :  { %v4515_v62 = vsub.f32 %v791_v0, %v4491_v54 }
 0x18c   :  { %v909_v41 = vand.u32 4294901760, %v4501_v17  ;;  %v950_v5 = vand.u32 4294901760, %v949_v46  ;;  %v3423_v46 = vpack.c.bf16 %v971_v37, %v964_v6  ;;  %v4587_v6 = vld [vmem:[#allocation8 + $0x30] sm:$0xff]  ;;  %v4589_v37 = vld [vmem:[#allocation8 + $0x38] sm:$0xff] }
 0x18d   :  { %v899_v2 = vand.u32 4294901760, %v4515_v62 }
 0x18e   :  { %v910_v22 = vsub.f32 %v4501_v17, %v909_v41 }
 0x18f   :  { %v900_v0 = vsub.f32 %v4515_v62, %v899_v2 }
 0x190   :  { %v911_v4 = vand.u32 4294901760, %v910_v22  ;;  %v3451_v22 = vpack.c.bf16 %v4487_v55, %v4482_v34  ;;  %v1516_v34 = vld [vmem:[#allocation8 + $0x70] sm:$0xff]  ;;  %v1517_v55 = vld [vmem:[#allocation8 + $0x78] sm:$0xff] }
 0x191   :  { %v901_v38 = vand.u32 4294901760, %v900_v0  ;;  %v3419_v0 = vpack.c.bf16 %v957_v57, %v950_v5  ;;  %v1526_v57 = vand.u32 4294901760, %v4553_v10  ;;  %v5013_v5 = vand.u32 4294901760, %v4557_v52 }
 0x193   :  { %2799 = vmatprep.mubr.f32.mxu1 %v901_v38  ;;  %v4709_v36 = vsub.f32 %v4553_v10, %v1526_v57 }
 0x194   :  { %2800 = vmatmul.mubr.f32.vlgmr.msra.gmra.mrb[2].mxu1 %v911_v4  ;;  %v4563_v4 = vld [vmem:[#allocation8 + $0x18] sm:$0xff] }
 0x195   :  { %3414 = vmatpush3.bf16.msra.mxu1 %v4385_v24  ;;  %2834 = vmatprep.mubr.f32.mxu1 %v4491_v54  ;;  %v3447_v24 = vpack.c.bf16 %v4475_v45, %v4470_v18  ;;  %v5022_v18 = vand.u32 4294901760, %v4416_v25  ;;  %v1629_v20 = vand.u32 4294901760, %v4709_v36 }
 0x196   :  { %3416 = vmatprep.subr.bf16.mxu1 %v3415_v1 }
 0x199   :  { %3418 = vmatpush3.bf16.msra.mxu1 %v3415_v1 }
 0x19a   :  { %3420 = vmatprep.subr.bf16.mxu1 %v3419_v0 }
 0x19d   :  { %3422 = vmatpush3.bf16.msra.mxu1 %v3419_v0 }
 0x19e   :  { %3424 = vmatprep.subr.bf16.mxu1 %v3423_v46 }
 0x1a1   :  { %3426 = vmatpush3.bf16.msra.mxu1 %v3423_v46  ;;  %v3455_v46 = vpack.c.bf16 %v4512_v49, %v4507_v30  ;;  %v1630_v30 = vsub.f32 %v4709_v36, %v1629_v20 }
 0x1a2   :  { %3428 = vmatprep.subr.bf16.mxu1 %v4406_v13 }
 0x1a5   :  { %3430 = vmatpush3.bf16.msra.mxu1 %v4406_v13  ;;  %v4555_v13 = vld [vmem:[#allocation8 + $0x8] sm:$0xff] }
 0x1a6   :  { %3432 = vmatprep.subr.bf16.mxu1 %v4420_v58 }
 0x1a9   :  { %3434 = vmatpush3.bf16.msra.mxu1 %v4420_v58  ;;  %v5014_v58 = vand.u32 4294901760, %v4555_v13 }
 0x1aa   :  { %3436 = vmatprep.subr.bf16.mxu1 %v4440_v12 }
 0x1ab   :  { %v4577_v56 = vpack.c.bf16 %v5014_v58, %v1526_v57 }
 0x1ad   :  { %3438 = vmatpush3.bf16.msra.mxu1 %v4440_v12  ;;  %v4566_v12 = vld [vmem:[#allocation8 + $0x20] sm:$0xff]  ;;  %3572 = vmatprep.subr.bf16.mxu0 %v4577_v56 }
 0x1ae   :  { %3440 = vmatprep.subr.bf16.mxu1 %v4442_v44  ;;  %v1538_v38 = vand.u32 4294901760, %v4566_v12  ;;  %3574 = vmatpush3.bf16.msra.mxu0 %v4577_v56 }
 0x1b1   :  { %3442 = vmatpush3.bf16.msra.mxu1 %v4442_v44  ;;  %v4568_v44 = vld [vmem:[#allocation8 + $0x28] sm:$0xff] }
 0x1b2   :  { %3444 = vmatprep.subr.bf16.mxu1 %v4446_v51  ;;  %v1541_v1 = vand.u32 4294901760, %v4568_v44 }
 0x1b4   :  { %2835 = vmatmul.mubr.f32.vlgmr.msra.gmra.mrb[2].mxu1 %v4489_v15 }
 0x1b5   :  { %3446 = vmatpush3.bf16.msra.mxu1 %v4446_v51  ;;  %2869 = vmatprep.mubr.f32.mxu1 %v4515_v62  ;;  %v5012_v51 = vand.u32 4294901760, %v4563_v4  ;;  %v1631_v62 = vand.u32 4294901760, %v1630_v30 }
 0x1b6   :  { %3448 = vmatprep.subr.bf16.mxu1 %v3447_v24 }
 0x1b7   :  { %v4585_v0 = vpack.c.bf16 %v5012_v51, %v5013_v5  ;;  %v4600_v51 = vpack.c.bf16 %v1541_v1, %v1538_v38  ;;  %v1544_v5 = vand.u32 4294901760, %v4587_v6 }
 0x1b9   :  { %3450 = vmatpush3.bf16.msra.mxu1 %v3447_v24  ;;  %3576 = vmatprep.subr.bf16.mxu0 %v4585_v0  ;;  %v1547_v24 = vand.u32 4294901760, %v4589_v37 }
 0x1ba   :  { %3452 = vmatprep.subr.bf16.mxu1 %v3451_v22  ;;  %3578 = vmatpush3.bf16.msra.mxu0 %v4585_v0 }
 0x1bb   :  { %3580 = vmatprep.subr.bf16.mxu0 %v4600_v51  ;;  %v4610_v58 = vpack.c.bf16 %v1547_v24, %v1544_v5 }
 0x1bd   :  { %3454 = vmatpush3.bf16.msra.mxu1 %v3451_v22 }
 0x1be   :  { %3456 = vmatprep.subr.bf16.mxu1 %v3455_v46  ;;  %3582 = vmatpush3.bf16.msra.mxu0 %v4600_v51 }
 0x1bf   :  { %3584 = vmatprep.subr.bf16.mxu0 %v4610_v58 }
 0x1c1   :  { %3458 = vmatpush3.bf16.msra.mxu1 %v3455_v46 }
 0x1c2   :  { %3460 = vmatprep.subr.bf16.mxu1 %v4450_v19  ;;  %3586 = vmatpush3.bf16.msra.mxu0 %v4610_v58 }
 0x1c5   :  { %3462 = vmatpush3.bf16.msra.mxu1 %v4450_v19  ;;  %v3507_v19 = vpack.c.bf16 %v927_v43, %v920_v16  ;;  %v3523_v16 = vpack.c.bf16 %v983_v27, %v976_v33  ;;  %v5020_v43 = vand.u32 4294901760, %v4402_v31  ;;  %v3535_v33 = vpack.c.bf16 %v5024_v32, %v5023_v26 }
 0x1c6   :  { %3464 = vmatprep.subr.bf16.mxu1 %v4454_v21  ;;  %v1559_v31 = vand.u32 4294901760, %v1513_v28 }
 0x1c9   :  { %3466 = vmatpush3.bf16.msra.mxu1 %v4454_v21  ;;  %v3511_v21 = vpack.c.bf16 %v941_v14, %v934_v11  ;;  %v5025_v11 = vand.u32 4294901760, %v4555_v13 }
 0x1ca   :  { %3468 = vmatprep.subr.bf16.mxu1 %v4458_v47 }
 0x1cb   :  { %v4714_v14 = vsub.f32 %v4555_v13, %v5025_v11 }
 0x1cd   :  { %3470 = vmatpush3.bf16.msra.mxu1 %v4458_v47  ;;  %v3527_v47 = vpack.c.bf16 %v5020_v43, %v990_v39  ;;  %v1514_v39 = vld [vmem:[#allocation8 + $0x60] sm:$0xff] }
 0x1ce   :  { %3472 = vmatprep.subr.bf16.mxu1 %v4462_v48 }
 0x1d1   :  { %3474 = vmatpush3.bf16.msra.mxu1 %v4462_v48  ;;  %v5021_v48 = vand.u32 4294901760, %v4414_v23  ;;  %v1562_v23 = vand.u32 4294901760, %v1514_v39 }
 0x1d2   :  { %3476 = vmatprep.subr.bf16.mxu1 %v4312_v59 }
 0x1d3   :  { %v3531_v45 = vpack.c.bf16 %v5022_v18, %v5021_v48  ;;  %v4759_v18 = vsub.f32 %v1514_v39, %v1562_v23 }
 0x1d4   :  { %2870 = vmatmul.mubr.f32.vlgmr.msra.gmra.mrb[2].mxu1 %v4501_v17  ;;  %v1636_v17 = vand.u32 4294901760, %v4714_v14 }
 0x1d5   :  { %3478 = vmatpush3.bf16.msra.mxu1 %v4312_v59  ;;  %2904 = vmatprep.mubr.f32.mxu1 %v899_v2 }
 0x1d6   :  { %3480 = vmatprep.subr.bf16.mxu1 %v4326_v53  ;;  %v1637_v49 = vsub.f32 %v4714_v14, %v1636_v17 }
 0x1d9   :  { %3482 = vmatpush3.bf16.msra.mxu1 %v4326_v53 }
 0x1da   :  { %3484 = vmatprep.subr.bf16.mxu1 %v4342_v60 }
 0x1dd   :  { %3486 = vmatpush3.bf16.msra.mxu1 %v4342_v60 }
 0x1de   :  { %3488 = vmatprep.subr.bf16.mxu1 %v4352_v40 }
 0x1e1   :  { %3490 = vmatpush3.bf16.msra.mxu1 %v4352_v40 }
 0x1e2   :  { %3492 = vmatprep.subr.bf16.mxu1 %v4357_v61 }
 0x1e5   :  { %3494 = vmatpush3.bf16.msra.mxu1 %v4357_v61 }
 0x1e6   :  { %3496 = vmatprep.subr.bf16.mxu1 %v4361_v3 }
 0x1e9   :  { %3498 = vmatpush3.bf16.msra.mxu1 %v4361_v3 }
 0x1ea   :  { %3500 = vmatprep.subr.bf16.mxu1 %v4365_v42 }
 0x1ed   :  { %3502 = vmatpush3.bf16.msra.mxu1 %v4365_v42 }
 0x1ee   :  { %3504 = vmatprep.subr.bf16.mxu1 %v4375_v50 }
 0x1f1   :  { %3506 = vmatpush3.bf16.msra.mxu1 %v4375_v50 }
 0x1f2   :  { %3508 = vmatprep.subr.bf16.mxu1 %v3507_v19 }
 0x1f4   :  { %2905 = vmatmul.mubr.f32.vlgmr.msra.gmra.mrb[2].mxu1 %v909_v41  ;;  %v1638_v41 = vand.u32 4294901760, %v1637_v49 }
 0x1f5   :  { %3510 = vmatpush3.bf16.msra.mxu1 %v3507_v19  ;;  %2939 = vmatprep.mubr.f32.mxu1 %v4491_v54  ;;  %v4747_v19 = vsub.f32 %v1513_v28, %v1559_v31 }
 0x1f6   :  { %3512 = vmatprep.subr.bf16.mxu1 %v3511_v21  ;;  %v4730_v2 = vpack.c.bf16 %v1638_v41, %v1631_v62 }
 0x1f9   :  { %3514 = vmatpush3.bf16.msra.mxu1 %v3511_v21 }
 0x1fa   :  { %3516 = vmatprep.subr.bf16.mxu1 %v3515_v7 }
 0x1fd   :  { %3518 = vmatpush3.bf16.msra.mxu1 %v3515_v7 }
 0x1fe   :  { %3520 = vmatprep.subr.bf16.mxu1 %v3519_v9 }
 0x201   :  { %3522 = vmatpush3.bf16.msra.mxu1 %v3519_v9 }
 0x202   :  { %3524 = vmatprep.subr.bf16.mxu1 %v3523_v16 }
 0x205   :  { %3526 = vmatpush3.bf16.msra.mxu1 %v3523_v16  ;;  %v5019_v16 = vand.u32 4294901760, %v4747_v19 }
 0x206   :  { %3528 = vmatprep.subr.bf16.mxu1 %v3527_v47 }
 0x207   :  { %v1707_v48 = vsub.f32 %v4747_v19, %v5019_v16 }
 0x209   :  { %3530 = vmatpush3.bf16.msra.mxu1 %v3527_v47  ;;  %v1708_v32 = vand.u32 4294901760, %v1707_v48 }
 0x20a   :  { %3532 = vmatprep.subr.bf16.mxu1 %v3531_v45 }
 0x20d   :  { %3534 = vmatpush3.bf16.msra.mxu1 %v3531_v45 }
 0x20e   :  { %3536 = vmatprep.subr.bf16.mxu1 %v3535_v33 }
 0x211   :  { %3538 = vmatpush3.bf16.msra.mxu1 %v3535_v33  ;;  %v5018_v33 = vand.u32 4294901760, %v4759_v18 }
 0x212   :  { %3540 = vmatprep.subr.bf16.mxu1 %v4312_v59 }
 0x214   :  { %2940 = vmatmul.mubr.f32.vlgmr.msra.gmra.mrb[2].mxu1 %v4489_v15 }
 0x215   :  { %3542 = vmatpush3.bf16.msra.mxu1 %v4312_v59  ;;  %2974 = vmatprep.mubr.f32.mxu1 %v4491_v54  ;;  %v1510_v59 = vld [vmem:[#allocation8 + $0x40] sm:$0xff]  ;;  %v1571_v54 = vand.u32 4294901760, %v1517_v55 }
 0x216   :  { %3544 = vmatprep.subr.bf16.mxu1 %v4326_v53 }
 0x219   :  { %3546 = vmatpush3.bf16.msra.mxu1 %v4326_v53  ;;  %v1511_v53 = vld [vmem:[#allocation8 + $0x48] sm:$0xff] }
 0x21a   :  { %3548 = vmatprep.subr.bf16.mxu1 %v4342_v60 }
 0x21d   :  { %3550 = vmatpush3.bf16.msra.mxu1 %v4342_v60  ;;  %v1550_v60 = vand.u32 4294901760, %v1510_v59 }
 0x21e   :  { %3552 = vmatprep.subr.bf16.mxu1 %v4352_v40 }
 0x21f   :  { %v4733_v29 = vsub.f32 %v1510_v59, %v1550_v60 }
 0x221   :  { %3554 = vmatpush3.bf16.msra.mxu1 %v4352_v40  ;;  %v1553_v40 = vand.u32 4294901760, %v1511_v53  ;;  %v1685_v10 = vand.u32 4294901760, %v4733_v29 }
 0x222   :  { %3556 = vmatprep.subr.bf16.mxu1 %v4357_v61 }
 0x223   :  { %v4696_v27 = vpack.c.bf16 %v1553_v40, %v1550_v60  ;;  %v4735_v35 = vsub.f32 %v1511_v53, %v1553_v40  ;;  %v1686_v57 = vsub.f32 %v4733_v29, %v1685_v10  ;;  %v1714_v60 = vsub.f32 %v4759_v18, %v5018_v33 }
 0x225   :  { %3558 = vmatpush3.bf16.msra.mxu1 %v4357_v61  ;;  %v1512_v61 = vld [vmem:[#allocation8 + $0x50] sm:$0xff]  ;;  %3588 = vmatprep.subr.bf16.mxu0 %v4696_v27  ;;  %v1692_v13 = vand.u32 4294901760, %v4735_v35  ;;  %v1687_v21 = vand.u32 4294901760, %v1686_v57  ;;  %v4795_v30 = vpack.c.bf16 %v4735_v35, %v4733_v29 }
 0x226   :  { %3560 = vmatprep.subr.bf16.mxu1 %v4361_v3  ;;  %3590 = vmatpush3.bf16.msra.mxu0 %v4696_v27  ;;  %v2231_v57 = vld [vmem:[%s5003_s4] ss:$0 sm:$0xff] }
 0x227   :  { %v1693_v22 = vsub.f32 %v4735_v35, %v1692_v13 }
 0x229   :  { %3562 = vmatpush3.bf16.msra.mxu1 %v4361_v3  ;;  %v1556_v3 = vand.u32 4294901760, %v1512_v61  ;;  %v1694_v7 = vand.u32 4294901760, %v1693_v22  ;;  %v5026_v22 = vand.u32 4294901760, %v4557_v52 }
 0x22a   :  { %3564 = vmatprep.subr.bf16.mxu1 %v4365_v42 }
 0x22b   :  { %v4745_v46 = vsub.f32 %v1512_v61, %v1556_v3  ;;  %v4751_v43 = vpack.c.bf16 %v1694_v7, %v1687_v21  ;;  %v4772_v61 = vsub.f32 %v1517_v55, %v1571_v54  ;;  %v4815_v21 = vsub.f32 %v4557_v52, %v5026_v22 }
 0x22c   :  { %v5027_v7 = vand.u32 4294901760, %v4563_v4  ;;  %v4857_v22 = vsub.f32 %v4589_v37, %v1547_v24 }
 0x22d   :  { %3566 = vmatpush3.bf16.msra.mxu1 %v4365_v42  ;;  %v4700_v42 = vpack.c.bf16 %v1559_v31, %v1556_v3  ;;  %v1699_v9 = vand.u32 4294901760, %v4745_v46  ;;  %v1715_v3 = vand.u32 4294901760, %v1714_v60  ;;  %v5015_v39 = vand.u32 4294901760, %v4772_v61 }
 0x22e   :  { %3568 = vmatprep.subr.bf16.mxu1 %v4375_v50  ;;  %v4799_v49 = vpack.c.bf16 %v4747_v19, %v4745_v46  ;;  %v1678_v24 = vand.u32 4294901760, %v4857_v22  ;;  %v5032_v35 = vand.u32 4294901760, %v4772_v61 }
 0x22f   :  { %3592 = vmatprep.subr.bf16.mxu0 %v4700_v42  ;;  %v1700_v47 = vsub.f32 %v4745_v46, %v1699_v9 }
 0x230   :  { %3594 = vmatpush3.bf16.msra.mxu0 %v4700_v42  ;;  %v1679_v16 = vsub.f32 %v4857_v22, %v1678_v24 }
 0x231   :  { %3570 = vmatpush3.bf16.msra.mxu1 %v4375_v50  ;;  %v1515_v50 = vld [vmem:[#allocation8 + $0x68] sm:$0xff]  ;;  %v1701_v26 = vand.u32 4294901760, %v1700_v47  ;;  %v4820_v47 = vsub.f32 %v4563_v4, %v5027_v7 }
 0x232   :  { %v1565_v25 = vand.u32 4294901760, %v1515_v50 }
 0x233   :  { %v4765_v53 = vpack.c.bf16 %v1708_v32, %v1701_v26 }
 0x234   :  { %2975 = vmatmul.mubr.f32.vlgmr.msra.gmra.mrb[2].mxu1 %v4489_v15  ;;  %v4704_v63 = vpack.c.bf16 %v1565_v25, %v1562_v23  ;;  %v1568_v15 = vand.u32 4294901760, %v1516_v34  ;;  %v4761_v45 = vsub.f32 %v1515_v50, %v1565_v25  ;;  %v1735_v25 = vsub.f32 %v4772_v61, %v5015_v39 }
 0x236   :  { %3596 = vmatprep.subr.bf16.mxu0 %v4704_v63  ;;  %v4720_v8 = vpack.c.bf16 %v1571_v54, %v1568_v15  ;;  %v5017_v59 = vand.u32 4294901760, %v4761_v45  ;;  %v4770_v40 = vsub.f32 %v1516_v34, %v1568_v15  ;;  %v1736_v55 = vand.u32 4294901760, %v1735_v25 }
 0x237   :  { %3598 = vmatpush3.bf16.msra.mxu0 %v4704_v63  ;;  %v4791_v54 = vpack.c.bf16 %v4714_v14, %v4709_v36  ;;  %v4803_v62 = vpack.c.bf16 %v4761_v45, %v4759_v18 }
 0x238   :  { %3600 = vmatprep.subr.bf16.mxu0 %v4720_v8  ;;  %v1721_v28 = vsub.f32 %v4761_v45, %v5017_v59  ;;  %v5016_v31 = vand.u32 4294901760, %v4770_v40  ;;  %v4807_v41 = vpack.c.bf16 %v4772_v61, %v4770_v40  ;;  %v5031_v29 = vand.u32 4294901760, %v4770_v40 }
 0x23a   :  { %v1722_v50 = vand.u32 4294901760, %v1721_v28  ;;  %v1728_v23 = vsub.f32 %v4770_v40, %v5016_v31  ;;  %v1643_v28 = vand.u32 4294901760, %v4815_v21 }
 0x23b   :  { %3602 = vmatpush3.bf16.msra.mxu0 %v4720_v8 }
 0x23c   :  { %3604 = vmatprep.subr.bf16.mxu0 %v4730_v2  ;;  %v4785_v11 = vpack.c.bf16 %v1722_v50, %v1715_v3  ;;  %v1729_v34 = vand.u32 4294901760, %v1728_v23  ;;  %v1650_v3 = vand.u32 4294901760, %v4820_v47  ;;  %v4827_v50 = vsub.f32 %v4566_v12, %v1538_v38 }
 0x23d   :  { %v4832_v23 = vsub.f32 %v4568_v44, %v1541_v1  ;;  %v4852_v1 = vsub.f32 %v4587_v6, %v1544_v5 }
 0x23e   :  { %v4787_v15 = vpack.c.bf16 %v1736_v55, %v1729_v34  ;;  %v1644_v55 = vsub.f32 %v4815_v21, %v1643_v28  ;;  %v1651_v12 = vsub.f32 %v4820_v47, %v1650_v3  ;;  %v1657_v38 = vand.u32 4294901760, %v4827_v50 }
 0x23f   :  { %v1664_v44 = vand.u32 4294901760, %v4832_v23  ;;  %v1671_v37 = vand.u32 4294901760, %v4852_v1 }
 0x241   :  { %v1665_v6 = vsub.f32 %v4832_v23, %v1664_v44  ;;  %v1672_v33 = vsub.f32 %v4852_v1, %v1671_v37  ;;  %v3707_v36 = vpack.c.bf16 %v1664_v44, %v1657_v38  ;;  %v3711_v14 = vpack.c.bf16 %v1678_v24, %v1671_v37 }
 0x243   :  { %v1666_v59 = vand.u32 4294901760, %v1665_v6 }
 0x307   :  { %v2976_v48 = vpop.f32.mrb[2].mxu1 }
 0x308   :  { %v3767_v26 = vadd.f32 %v2976_v48, %v2231_v57  ;;  %v1490_v32 = vpop.f32.mrb[3].mxu1 }
 0x309   :  { %v3768_v60 = vadd.f32 %v2231_v57, %v1490_v32  ;;  %v1645_v32 = vand.u32 4294901760, %v1644_v55 }
 0x30a   :  { %v1501_v52 = vmax.f32 %v3767_v26, 0.0 }
 0x30b   :  { %v1500_v4 = vmax.f32 %v3768_v60, 0.0  ;;  %v1652_v60 = vand.u32 4294901760, %v1651_v12 }
 0x30c   :  { %v4834_v25 = vand.u32 4294901760, %v1501_v52 }
 0x30d   :  { %v4836_v34 = vand.u32 4294901760, %v1500_v4  ;;  %v3607_v12 = vpack.c.bf16 %v1652_v60, %v1645_v32  ;;  %v1673_v32 = vand.u32 4294901760, %v1672_v33  ;;  %v1680_v60 = vand.u32 4294901760, %v1679_v16 }
 0x30e   :  { %v4846_v57 = vsub.f32 %v1501_v52, %v4834_v25  ;;  %v1658_v52 = vsub.f32 %v4827_v50, %v1657_v38  ;;  %v3643_v16 = vpack.c.bf16 %v4832_v23, %v4827_v50  ;;  %v3699_v33 = vpack.c.bf16 %v1636_v17, %v1629_v20 }
 0x30f   :  { %v4860_v7 = vsub.f32 %v1500_v4, %v4836_v34  ;;  %v3715_v20 = vpack.c.bf16 %v1692_v13, %v1685_v10  ;;  %v5028_v17 = vand.u32 4294901760, %v4747_v19  ;;  %v3727_v10 = vpack.c.bf16 %v5032_v35, %v5031_v29 }
 0x310   :  { %v1618_v48 = vand.u32 4294901760, %v4846_v57  ;;  %v1659_v39 = vand.u32 4294901760, %v1658_v52  ;;  %v3615_v52 = vpack.c.bf16 %v1680_v60, %v1673_v32 }
 0x311   :  { %v1608_v26 = vand.u32 4294901760, %v4860_v7 }
 0x312   :  { %v1619_v5 = vsub.f32 %v4846_v57, %v1618_v48 }
 0x313   :  { %v1609_v4 = vsub.f32 %v4860_v7, %v1608_v26 }
 0x314   :  { %v1620_v31 = vand.u32 4294901760, %v1619_v5 }
 0x315   :  { %v1610_v55 = vand.u32 4294901760, %v1609_v4  ;;  %v3611_v4 = vpack.c.bf16 %v1666_v59, %v1659_v39  ;;  %v3703_v59 = vpack.c.bf16 %v1650_v3, %v1643_v28  ;;  %v5030_v39 = vand.u32 4294901760, %v4761_v45 }
 0x317   :  { %3009 = vmatprep.mubr.f32.mxu0 %v1610_v55 }
 0x318   :  { %3010 = vmatmul.mubr.f32.vlgmr.msra.gmra.mrb[2].mxu0 %v1620_v31  ;;  %v5029_v31 = vand.u32 4294901760, %v4759_v18 }
 0x319   :  { %3606 = vmatpush3.bf16.msra.mxu0 %v4730_v2  ;;  %3044 = vmatprep.mubr.f32.mxu0 %v4836_v34  ;;  %v3639_v2 = vpack.c.bf16 %v4820_v47, %v4815_v21 }
 0x31a   :  { %3608 = vmatprep.subr.bf16.mxu0 %v3607_v12 }
 0x31d   :  { %3610 = vmatpush3.bf16.msra.mxu0 %v3607_v12 }
 0x31e   :  { %3612 = vmatprep.subr.bf16.mxu0 %v3611_v4 }
 0x321   :  { %3614 = vmatpush3.bf16.msra.mxu0 %v3611_v4 }
 0x322   :  { %3616 = vmatprep.subr.bf16.mxu0 %v3615_v52 }
 0x325   :  { %3618 = vmatpush3.bf16.msra.mxu0 %v3615_v52 }
 0x326   :  { %3620 = vmatprep.subr.bf16.mxu0 %v4751_v43 }
 0x329   :  { %3622 = vmatpush3.bf16.msra.mxu0 %v4751_v43  ;;  %v3647_v43 = vpack.c.bf16 %v4857_v22, %v4852_v1 }
 0x32a   :  { %3624 = vmatprep.subr.bf16.mxu0 %v4765_v53 }
 0x32d   :  { %3626 = vmatpush3.bf16.msra.mxu0 %v4765_v53  ;;  %v3719_v53 = vpack.c.bf16 %v5028_v17, %v1699_v9 }
 0x32e   :  { %3628 = vmatprep.subr.bf16.mxu0 %v4785_v11 }
 0x331   :  { %3630 = vmatpush3.bf16.msra.mxu0 %v4785_v11  ;;  %v3723_v11 = vpack.c.bf16 %v5030_v39, %v5029_v31 }
 0x332   :  { %3632 = vmatprep.subr.bf16.mxu0 %v4787_v15 }
 0x335   :  { %3634 = vmatpush3.bf16.msra.mxu0 %v4787_v15 }
 0x336   :  { %3636 = vmatprep.subr.bf16.mxu0 %v4791_v54 }
 0x338   :  { %3045 = vmatmul.mubr.f32.vlgmr.msra.gmra.mrb[2].mxu0 %v4834_v25 }
 0x339   :  { %3638 = vmatpush3.bf16.msra.mxu0 %v4791_v54  ;;  %3079 = vmatprep.mubr.f32.mxu0 %v4860_v7 }
 0x33a   :  { %3640 = vmatprep.subr.bf16.mxu0 %v3639_v2 }
 0x33d   :  { %3642 = vmatpush3.bf16.msra.mxu0 %v3639_v2 }
 0x33e   :  { %3644 = vmatprep.subr.bf16.mxu0 %v3643_v16 }
 0x341   :  { %3646 = vmatpush3.bf16.msra.mxu0 %v3643_v16 }
 0x342   :  { %3648 = vmatprep.subr.bf16.mxu0 %v3647_v43 }
 0x345   :  { %3650 = vmatpush3.bf16.msra.mxu0 %v3647_v43 }
 0x346   :  { %3652 = vmatprep.subr.bf16.mxu0 %v4795_v30 }
 0x349   :  { %3654 = vmatpush3.bf16.msra.mxu0 %v4795_v30 }
 0x34a   :  { %3656 = vmatprep.subr.bf16.mxu0 %v4799_v49 }
 0x34d   :  { %3658 = vmatpush3.bf16.msra.mxu0 %v4799_v49 }
 0x34e   :  { %3660 = vmatprep.subr.bf16.mxu0 %v4803_v62 }
 0x351   :  { %3662 = vmatpush3.bf16.msra.mxu0 %v4803_v62 }
 0x352   :  { %3664 = vmatprep.subr.bf16.mxu0 %v4807_v41 }
 0x355   :  { %3666 = vmatpush3.bf16.msra.mxu0 %v4807_v41 }
 0x356   :  { %3668 = vmatprep.subr.bf16.mxu0 %v4577_v56 }
 0x358   :  { %3080 = vmatmul.mubr.f32.vlgmr.msra.gmra.mrb[2].mxu0 %v4846_v57 }
 0x359   :  { %3670 = vmatpush3.bf16.msra.mxu0 %v4577_v56  ;;  %3114 = vmatprep.mubr.f32.mxu0 %v1608_v26 }
 0x35a   :  { %3672 = vmatprep.subr.bf16.mxu0 %v4585_v0 }
 0x35d   :  { %3674 = vmatpush3.bf16.msra.mxu0 %v4585_v0 }
 0x35e   :  { %3676 = vmatprep.subr.bf16.mxu0 %v4600_v51 }
 0x361   :  { %3678 = vmatpush3.bf16.msra.mxu0 %v4600_v51 }
 0x362   :  { %3680 = vmatprep.subr.bf16.mxu0 %v4610_v58 }
 0x365   :  { %3682 = vmatpush3.bf16.msra.mxu0 %v4610_v58 }
 0x366   :  { %3684 = vmatprep.subr.bf16.mxu0 %v4696_v27 }
 0x369   :  { %3686 = vmatpush3.bf16.msra.mxu0 %v4696_v27 }
 0x36a   :  { %3688 = vmatprep.subr.bf16.mxu0 %v4700_v42 }
 0x36d   :  { %3690 = vmatpush3.bf16.msra.mxu0 %v4700_v42 }
 0x36e   :  { %3692 = vmatprep.subr.bf16.mxu0 %v4704_v63 }
 0x371   :  { %3694 = vmatpush3.bf16.msra.mxu0 %v4704_v63 }
 0x372   :  { %3696 = vmatprep.subr.bf16.mxu0 %v4720_v8 }
 0x375   :  { %3698 = vmatpush3.bf16.msra.mxu0 %v4720_v8 }
 0x376   :  { %3700 = vmatprep.subr.bf16.mxu0 %v3699_v33 }
 0x378   :  { %3115 = vmatmul.mubr.f32.vlgmr.msra.gmra.mrb[2].mxu0 %v1618_v48 }
 0x379   :  { %3702 = vmatpush3.bf16.msra.mxu0 %v3699_v33  ;;  %3149 = vmatprep.mubr.f32.mxu0 %v4836_v34 }
 0x37a   :  { %3704 = vmatprep.subr.bf16.mxu0 %v3703_v59 }
 0x37d   :  { %3706 = vmatpush3.bf16.msra.mxu0 %v3703_v59 }
 0x37e   :  { %3708 = vmatprep.subr.bf16.mxu0 %v3707_v36 }
 0x381   :  { %3710 = vmatpush3.bf16.msra.mxu0 %v3707_v36 }
 0x382   :  { %3712 = vmatprep.subr.bf16.mxu0 %v3711_v14 }
 0x385   :  { %3714 = vmatpush3.bf16.msra.mxu0 %v3711_v14 }
 0x386   :  { %3716 = vmatprep.subr.bf16.mxu0 %v3715_v20 }
 0x389   :  { %3718 = vmatpush3.bf16.msra.mxu0 %v3715_v20 }
 0x38a   :  { %3720 = vmatprep.subr.bf16.mxu0 %v3719_v53 }
 0x38d   :  { %3722 = vmatpush3.bf16.msra.mxu0 %v3719_v53 }
 0x38e   :  { %3724 = vmatprep.subr.bf16.mxu0 %v3723_v11 }
 0x391   :  { %3726 = vmatpush3.bf16.msra.mxu0 %v3723_v11 }
 0x392   :  { %3728 = vmatprep.subr.bf16.mxu0 %v3727_v10 }
 0x395   :  { %3730 = vmatpush3.bf16.msra.mxu0 %v3727_v10 }
 0x396   :  { %3732 = vmatprep.subr.bf16.mxu0 %v4577_v56 }
 0x398   :  { %3150 = vmatmul.mubr.f32.vlgmr.msra.gmra.mrb[2].mxu0 %v4834_v25 }
 0x399   :  { %3734 = vmatpush3.bf16.msra.mxu0 %v4577_v56  ;;  %3184 = vmatprep.mubr.f32.mxu0 %v4836_v34 }
 0x39a   :  { %3736 = vmatprep.subr.bf16.mxu0 %v4585_v0 }
 0x39d   :  { %3738 = vmatpush3.bf16.msra.mxu0 %v4585_v0 }
 0x39e   :  { %3740 = vmatprep.subr.bf16.mxu0 %v4600_v51 }
 0x3a1   :  { %3742 = vmatpush3.bf16.msra.mxu0 %v4600_v51 }
 0x3a2   :  { %3744 = vmatprep.subr.bf16.mxu0 %v4610_v58 }
 0x3a5   :  { %3746 = vmatpush3.bf16.msra.mxu0 %v4610_v58  ;;  %v2232_v58 = vld [vmem:[%s5005_s6] ss:$0 sm:$0xff] }
 0x3a6   :  { %3748 = vmatprep.subr.bf16.mxu0 %v4696_v27 }
 0x3a9   :  { %3750 = vmatpush3.bf16.msra.mxu0 %v4696_v27 }
 0x3aa   :  { %3752 = vmatprep.subr.bf16.mxu0 %v4700_v42 }
 0x3ad   :  { %3754 = vmatpush3.bf16.msra.mxu0 %v4700_v42 }
 0x3ae   :  { %3756 = vmatprep.subr.bf16.mxu0 %v4704_v63 }
 0x3b1   :  { %3758 = vmatpush3.bf16.msra.mxu0 %v4704_v63 }
 0x3b2   :  { %3760 = vmatprep.subr.bf16.mxu0 %v4720_v8 }
 0x3b5   :  { %3762 = vmatpush3.bf16.msra.mxu0 %v4720_v8 }
 0x3b8   :  { %3185 = vmatmul.mubr.f32.vlgmr.msra.gmra.mrb[2].mxu0 %v4834_v25 }
 0x48b   :  { %v3186_v51 = vpop.f32.mrb[2].mxu0 }
 0x48c   :  { %v3769_v56 = vadd.f32 %v3186_v51, %v2232_v58  ;;  %v2199_v0 = vpop.f32.mrb[3].mxu0 }
 0x48d   :  { %v3770_v27 = vadd.f32 %v2232_v58, %v2199_v0 }
 0x48e   :  { %2210 = vst [vmem:[#allocation10 + $0x8] sm:$0xff] %v3769_v56 }
 0x48f   :  { %2209 = vst [vmem:[#allocation10] sm:$0xff] %v3770_v27 }
 0x490   :  { %3905 = shalt.err (!%p3902_p8)
}
 0x491   :  { %s3906_s6 = scalar_lea.hbm %s5006_s7, 256 }
 0x492   :  { %p3907_p9 = scmp.ne.s32.totalorder %s5006_s7, %s3906_s6  ;;  %p3910_p10 = scmp.lt.u32.totalorder %s3906_s6, %s5006_s7 }
 0x494   :  { %p3912_p11 = pnand %p3910_p10, %p3907_p9 }
 0x496   :  { %3915 = shalt.err (!%p3912_p11)
}
 0x497   :  { %2222 = dma.vmem_to_hbm [thread:$0]  %s2217_s8, 256, %s5006_s7, [#allocation4], %s3926_s13, %s3926_s13, %s3927_s14  }
 0x498   :  { %3922 = dma.done.wait [#allocation4], 256  }
 0x499   :  { %3923 = vsyncadd [#allocation4], 4294967040 }
 0x49a   :  { %2226 = vsyncpa [#allocation3], 1 }
 0x49b   :  { %2227 = vsyncpa [#allocation6], 1 }
 0x49c   :  { %2228 = vsyncpa [#allocation9], 1 }
 0x49d   :  { %2229 = vsyncpa [#allocation4], 1 }

</bundles_post_ra>
